<compile_context>
chip_gen: v6e
topology: v6e:2x2x1
jax: 0.10.0
libtpu: 0.0.40
codegen_flags: <defaults>
</compile_context>

<pallas_src>
import functools

import jax
import jax.numpy as jnp
from jax.experimental import pallas as pl
from jax.experimental.pallas import tpu as pltpu


# ---------------------------------------------------------------------------
# Deterministic "module parameters" (YoloV2Loss has no learned weights).
# ---------------------------------------------------------------------------
NUM_CLASSES = 3
SCALED_ANCHORS = jnp.array([[1.5, 2.0],
                            [3.0, 3.5],
                            [5.0, 4.5]], dtype=jnp.float32)   # [num_anchors, 2]
LAMBDA_OBJ = 5.0
LAMBDA_NOOBJ = 0.5
LAMBDA_COORD = 1.0
LAMBDA_CLASS = 1.0
IGNORE_THRESHOLD = 0.5


def _round_up(x, m):
    return ((x + m - 1) // m) * m


# ---------------------------------------------------------------------------
# IoU (same formula as the torch reference) -- used only in encode_target glue.
# ---------------------------------------------------------------------------
def _iou(boxes1, boxes2):
    b1_xmin = (boxes1[..., 0:1] - boxes1[..., 2:3]) / 2.0
    b1_ymin = (boxes1[..., 1:2] - boxes1[..., 3:4]) / 2.0
    b1_xmax = (boxes1[..., 0:1] + boxes1[..., 2:3]) / 2.0
    b1_ymax = (boxes1[..., 1:2] + boxes1[..., 3:4]) / 2.0
    b2_xmin = (boxes2[..., 0:1] - boxes2[..., 2:3]) / 2.0
    b2_ymin = (boxes2[..., 1:2] - boxes2[..., 3:4]) / 2.0
    b2_xmax = (boxes2[..., 0:1] + boxes2[..., 2:3]) / 2.0
    b2_ymax = (boxes2[..., 1:2] + boxes2[..., 3:4]) / 2.0
    inter_xmin = jnp.maximum(b1_xmin, b2_xmin)
    inter_ymin = jnp.maximum(b1_ymin, b2_ymin)
    inter_xmax = jnp.minimum(b1_xmax, b2_xmax)
    inter_ymax = jnp.minimum(b1_ymax, b2_ymax)
    inter = jnp.clip(inter_xmax - inter_xmin, 0) * jnp.clip(inter_ymax - inter_ymin, 0)
    a1 = jnp.abs((b1_xmax - b1_xmin) * (b1_ymax - b1_ymin))
    a2 = jnp.abs((b2_xmax - b2_xmin) * (b2_ymax - b2_ymin))
    return inter / (a1 + a2 - inter + 1e-6)


# ---------------------------------------------------------------------------
# encode_target: plain-JAX glue, vectorized over batch, fori_loop over annots.
# Sequential order over annotations preserves torch's last-writer-wins scatter.
# ---------------------------------------------------------------------------
def _encode_target(target, num_classes, scaled_anchors, layer_w, layer_h,
                   ignore_threshold):
    B, T, _ = target.shape
    A = scaled_anchors.shape[0]
    shape = (B, A, layer_h, layer_w)
    b_idx = jnp.arange(B)
    a_idx = jnp.arange(A)

    anchors_box = jnp.concatenate(
        [jnp.zeros((A, 2), jnp.float32), scaled_anchors.astype(jnp.float32)], axis=1)

    init = dict(
        mask=jnp.zeros(shape, jnp.float32),
        noobj=jnp.ones(shape, jnp.float32),
        tx=jnp.zeros(shape, jnp.float32),
        ty=jnp.zeros(shape, jnp.float32),
        tw=jnp.zeros(shape, jnp.float32),
        th=jnp.zeros(shape, jnp.float32),
        tconf=jnp.zeros(shape, jnp.float32),
        tcls=jnp.zeros(shape + (num_classes,), jnp.float32),
    )

    def body(t, st):
        tgt = jax.lax.dynamic_index_in_dim(target, t, axis=1, keepdims=False)  # (B, 5)
        valid = jnp.sum(tgt, axis=-1) > 0.0                                     # (B,)
        gx = tgt[:, 0] * layer_w
        gy = tgt[:, 1] * layer_h
        gw = tgt[:, 2] * layer_w
        gh = tgt[:, 3] * layer_h
        gi = gx.astype(jnp.int32)
        gj = gy.astype(jnp.int32)

        gt_box = jnp.stack(
            [jnp.zeros_like(gw), jnp.zeros_like(gh), gw, gh], axis=-1)[:, None, :]
        iou = _iou(gt_box, anchors_box[None, :, :])[..., 0]    # (B, A)
        best_n = jnp.argmax(iou, axis=-1)                      # (B,)

        # noobj_mask[b, iou > thr, gj, gi] = 0 (valid rows only)
        sc_b = b_idx[:, None]
        sc_a = a_idx[None, :]
        old_no = st['noobj'][sc_b, sc_a, gj[:, None], gi[:, None]]          # (B, A)
        new_no = jnp.where(valid[:, None] & (iou > ignore_threshold), 0.0, old_no)
        noobj = st['noobj'].at[sc_b, sc_a, gj[:, None], gi[:, None]].set(new_no)

        def put(arr, val):
            old = arr[b_idx, best_n, gj, gi]
            return arr.at[b_idx, best_n, gj, gi].set(jnp.where(valid, val, old))

        anchor_w = scaled_anchors[best_n, 0]
        anchor_h = scaled_anchors[best_n, 1]
        best_iou = jnp.take_along_axis(iou, best_n[:, None], axis=-1)[:, 0]

        mask = put(st['mask'], jnp.ones_like(gx))
        tx = put(st['tx'], gx - gi.astype(jnp.float32))
        ty = put(st['ty'], gy - gj.astype(jnp.float32))
        tw = put(st['tw'], jnp.sqrt(gw / anchor_w))
        th = put(st['th'], jnp.sqrt(gh / anchor_h))
        tconf = put(st['tconf'], best_iou)

        cid = tgt[:, 4].astype(jnp.int32)
        old_cls = st['tcls'][b_idx, best_n, gj, gi, cid]
        tcls = st['tcls'].at[b_idx, best_n, gj, gi, cid].set(
            jnp.where(valid, 1.0, old_cls))

        return dict(mask=mask, noobj=noobj, tx=tx, ty=ty, tw=tw, th=th,
                    tconf=tconf, tcls=tcls)

    st = jax.lax.fori_loop(0, T, body, init)
    return (st['mask'], st['noobj'], st['tx'], st['ty'], st['tw'], st['th'],
            st['tconf'], st['tcls'])


# ---------------------------------------------------------------------------
# Pallas kernel: decode logits + fused masked MSE / BCE -> (8, TL) partial sums.
# ---------------------------------------------------------------------------
def _yolo_loss_kernel(pred_ref, tgt_ref, out_ref, *, num_classes):
    def clog(v):
        # PyTorch nn.BCELoss clamps log terms at -100 (handles log(0) = -inf).
        return jnp.maximum(jnp.log(v), -100.0)

    # Target channels: cheap leading-axis indexing (channel-major slab).
    m = tgt_ref[0]          # (TG, TL)
    noobj = tgt_ref[1]
    tx = tgt_ref[2]
    ty = tgt_ref[3]
    tw = tgt_ref[4]
    th = tgt_ref[5]
    tconf = tgt_ref[6]

    # Decoded predictions; each slice is (TG, TL) -> full (sublane, lane) use.
    px = jax.nn.sigmoid(pred_ref[:, 0, :])
    py = jax.nn.sigmoid(pred_ref[:, 1, :])
    pw = jnp.exp(0.5 * pred_ref[:, 2, :])      # == sqrt(exp(x)), one EUP op
    ph = jnp.exp(0.5 * pred_ref[:, 3, :])
    pconf = jax.nn.sigmoid(pred_ref[:, 4, :])

    # Coordinate loss: mask in {0,1}, so (p*m - t*m)^2 == m*(p-t)^2 exactly.
    dx = px - tx
    dy = py - ty
    dw = pw - tw
    dh = ph - th
    coord = m * (dx * dx + dy * dy + dw * dw + dh * dh)

    # Objectness BCE(conf*mask, tconf).
    pcm = pconf * m
    obj = -(tconf * clog(pcm) + (1.0 - tconf) * clog(1.0 - pcm))

    # No-object BCE(conf*noobj, 0): target is 0, only the log(1-p) branch.
    no_obj = -clog(1.0 - pconf * noobj)

    # Class BCE summed over classes, weighted by mask (== pred_cls[mask==1]).
    cls_bce = jnp.zeros_like(m)
    for c in range(num_classes):
        pc = jax.nn.sigmoid(pred_ref[:, 5 + c, :])
        tc = tgt_ref[7 + c]
        cls_bce = cls_bce - (tc * clog(pc) + (1.0 - tc) * clog(1.0 - pc))
    cls = m * cls_bce

    loss_el = (LAMBDA_COORD * coord + LAMBDA_OBJ * obj
               + LAMBDA_NOOBJ * no_obj + LAMBDA_CLASS * cls)

    tg, tl = loss_el.shape
    if tg == 8:
        part = loss_el
    else:
        part = loss_el.reshape(tg // 8, 8, tl).sum(axis=0)
    out_ref[0, :, :] = part


# ---------------------------------------------------------------------------
# Wrapper matching YoloV2Loss.forward(input, target).
# ---------------------------------------------------------------------------
def yolov2_loss(input_nchw, target, scaled_anchors, num_classes):
    B, CH, H, W = input_nchw.shape
    A = scaled_anchors.shape[0]
    D = 5 + num_classes
    assert CH == A * D

    mask, noobj, tx, ty, tw, th, tconf, tcls = _encode_target(
        target, num_classes, scaled_anchors, W, H, IGNORE_THRESHOLD)

    G = B * A
    HW = H * W
    HWP = _round_up(HW, 128)              # lane padding: full, unmasked vregs
    if HWP % 512 == 0:
        TL = 512
    elif HWP % 256 == 0:
        TL = 256
    else:
        TL = 128
    # Keep each per-channel (TG, TL) slice small enough to avoid vreg spills.
    TG = max(8, min(32, ((4096 // TL) // 8) * 8))
    TG = min(TG, _round_up(G, 8))
    G_pad = _round_up(G, TG)

    # Predictions: pure reshape of NCHW (no transpose); cells on lanes.
    pred = input_nchw.astype(jnp.float32).reshape(G, D, HW)
    pred = jnp.pad(pred, ((0, G_pad - G), (0, 0), (0, HWP - HW)))

    # Targets: channel-major slab [mask, noobj, tx, ty, tw, th, tconf, tcls...].
    # Padded groups/cells have mask = noobj = targets = 0 -> contribute 0.
    tgt = jnp.concatenate(
        [jnp.stack([mask, noobj, tx, ty, tw, th, tconf], axis=0),
         jnp.moveaxis(tcls, -1, 0)], axis=0).reshape(7 + num_classes, G, HW)
    tgt = jnp.pad(tgt, ((0, 0), (0, G_pad - G), (0, HWP - HW)))

    grid = (G_pad // TG, HWP // TL)
    kernel = functools.partial(_yolo_loss_kernel, num_classes=num_classes)
    partials = pl.pallas_call(
        kernel,
        out_shape=jax.ShapeDtypeStruct((grid[0], 8, HWP), jnp.float32),
        grid=grid,
        in_specs=[
            pl.BlockSpec((TG, D, TL), lambda i, j: (i, 0, j)),
            pl.BlockSpec((7 + num_classes, TG, TL), lambda i, j: (0, i, j)),
        ],
        out_specs=pl.BlockSpec((1, 8, TL), lambda i, j: (i, 0, j)),
        compiler_params=pltpu.CompilerParams(
            dimension_semantics=("parallel", "parallel")),
    )(pred, tgt)

    return jnp.sum(partials) * (1.0 / B)


# ---------------------------------------------------------------------------
# Pure-JAX reference (mirrors the torch math) for a correctness check.
# ---------------------------------------------------------------------------
def _reference_loss(input_nchw, target, scaled_anchors, num_classes):
    B, _, H, W = input_nchw.shape
    A = scaled_anchors.shape[0]
    D = 5 + num_classes
    pred = jnp.transpose(input_nchw.reshape(B, A, D, H, W), (0, 1, 3, 4, 2))
    x = jax.nn.sigmoid(pred[..., 0])
    y = jax.nn.sigmoid(pred[..., 1])
    w = jnp.sqrt(jnp.exp(pred[..., 2]))
    h = jnp.sqrt(jnp.exp(pred[..., 3]))
    conf = jax.nn.sigmoid(pred[..., 4])
    pcls = jax.nn.sigmoid(pred[..., 5:])
    mask, noobj, tx, ty, tw, th, tconf, tcls = _encode_target(
        target, num_classes, scaled_anchors, W, H, IGNORE_THRESHOLD)

    def bce(p, t):
        return -(t * jnp.maximum(jnp.log(p), -100.0)
                 + (1.0 - t) * jnp.maximum(jnp.log(1.0 - p), -100.0))

    def sse(a, b):
        d = a - b
        return jnp.sum(d * d)

    box = LAMBDA_COORD * (sse(x * mask, tx * mask) + sse(y * mask, ty * mask)
                          + sse(w * mask, tw * mask) + sse(h * mask, th * mask))
    obj = LAMBDA_OBJ * jnp.sum(bce(conf * mask, tconf))
    no_obj = LAMBDA_NOOBJ * jnp.sum(bce(conf * noobj, jnp.zeros_like(conf)))
    cls = LAMBDA_CLASS * jnp.sum(mask[..., None] * bce(pcls, tcls))
    return (box + obj + no_obj + cls) * (1.0 / B)


if __name__ == "__main__":
    B, A, H, W = 2, SCALED_ANCHORS.shape[0], 8, 8
    D = 5 + NUM_CLASSES
    max_annots = 4

    key = jax.random.PRNGKey(0)
    k1, k2, k3 = jax.random.split(key, 3)

    # input: [batch, num_anchors*(5+num_classes), H, W] (NCHW conv-head output)
    x = jax.random.normal(k1, (B, A * D, H, W), dtype=jnp.float32)

    # target: [batch, max_num_annots, 5(cx, cy, w, h, cid)], normalized coords
    boxes = jax.random.uniform(k2, (B, max_annots, 4), dtype=jnp.float32,
                               minval=0.1, maxval=0.9)
    cids = jax.random.randint(k3, (B, max_annots, 1), 0, NUM_CLASSES).astype(jnp.float32)
    target = jnp.concatenate([boxes, cids], axis=-1)
    # make the last annotation empty to exercise the "sum <= 0 -> skip" path
    target = target.at[:, -1, :].set(0.0)

    loss_fn = jax.jit(
        lambda inp, tgt: yolov2_loss(inp, tgt, SCALED_ANCHORS, NUM_CLASSES))
    loss = loss_fn(x, target)
    jax.block_until_ready(loss)

    ref = _reference_loss(x, target, SCALED_ANCHORS, NUM_CLASSES)
    jax.block_until_ready(ref)

    assert jnp.isfinite(loss), "loss is not finite"
    assert jnp.allclose(loss, ref, rtol=2e-3, atol=2e-3), (loss, ref)
    print("KERNEL_OK")
</pallas_src>

<mosaic_0001>
module attributes {stable_mosaic.version = 11 : i64} {
  func.func @_yolo_loss_kernel(%arg0: i32, %arg1: i32, %arg2: memref<8x8x128xf32, #tpu.memory_space<vmem>>, %arg3: memref<10x8x128xf32, #tpu.memory_space<vmem>>, %arg4: memref<1x8x128xf32, #tpu.memory_space<vmem>>) attributes {dimension_semantics = [#tpu.dimension_semantics<parallel>, #tpu.dimension_semantics<parallel>], iteration_bounds = array<i64: 1, 1>, scalar_prefetch = 0 : i64, scratch_operands = 0 : i64, tpu.core_type = #tpu.core_type<tc>, window_params = [{transform_indices = @transform_0, window_bounds = array<i64: 8, 8, 128>}, {transform_indices = @transform_1, window_bounds = array<i64: 10, 8, 128>}, {transform_indices = @transform_2, window_bounds = array<i64: 1, 8, 128>}]} {
    %c0 = arith.constant 0 : index
    %c0_0 = arith.constant 0 : index
    %c0_1 = arith.constant 0 : index
    %0 = vector.load %arg3[%c0, %c0_0, %c0_1] : memref<10x8x128xf32, #tpu.memory_space<vmem>>, vector<1x8x128xf32>
    %1 = vector.shape_cast %0 : vector<1x8x128xf32> to vector<8x128xf32>
    %c1 = arith.constant 1 : index
    %c0_2 = arith.constant 0 : index
    %c0_3 = arith.constant 0 : index
    %2 = vector.load %arg3[%c1, %c0_2, %c0_3] : memref<10x8x128xf32, #tpu.memory_space<vmem>>, vector<1x8x128xf32>
    %3 = vector.shape_cast %2 : vector<1x8x128xf32> to vector<8x128xf32>
    %c2 = arith.constant 2 : index
    %c0_4 = arith.constant 0 : index
    %c0_5 = arith.constant 0 : index
    %4 = vector.load %arg3[%c2, %c0_4, %c0_5] : memref<10x8x128xf32, #tpu.memory_space<vmem>>, vector<1x8x128xf32>
    %5 = vector.shape_cast %4 : vector<1x8x128xf32> to vector<8x128xf32>
    %c3 = arith.constant 3 : index
    %c0_6 = arith.constant 0 : index
    %c0_7 = arith.constant 0 : index
    %6 = vector.load %arg3[%c3, %c0_6, %c0_7] : memref<10x8x128xf32, #tpu.memory_space<vmem>>, vector<1x8x128xf32>
    %7 = vector.shape_cast %6 : vector<1x8x128xf32> to vector<8x128xf32>
    %c4 = arith.constant 4 : index
    %c0_8 = arith.constant 0 : index
    %c0_9 = arith.constant 0 : index
    %8 = vector.load %arg3[%c4, %c0_8, %c0_9] : memref<10x8x128xf32, #tpu.memory_space<vmem>>, vector<1x8x128xf32>
    %9 = vector.shape_cast %8 : vector<1x8x128xf32> to vector<8x128xf32>
    %c5 = arith.constant 5 : index
    %c0_10 = arith.constant 0 : index
    %c0_11 = arith.constant 0 : index
    %10 = vector.load %arg3[%c5, %c0_10, %c0_11] : memref<10x8x128xf32, #tpu.memory_space<vmem>>, vector<1x8x128xf32>
    %11 = vector.shape_cast %10 : vector<1x8x128xf32> to vector<8x128xf32>
    %c6 = arith.constant 6 : index
    %c0_12 = arith.constant 0 : index
    %c0_13 = arith.constant 0 : index
    %12 = vector.load %arg3[%c6, %c0_12, %c0_13] : memref<10x8x128xf32, #tpu.memory_space<vmem>>, vector<1x8x128xf32>
    %13 = vector.shape_cast %12 : vector<1x8x128xf32> to vector<8x128xf32>
    %c0_14 = arith.constant 0 : index
    %c0_15 = arith.constant 0 : index
    %c0_16 = arith.constant 0 : index
    %14 = vector.load %arg2[%c0_14, %c0_15, %c0_16] : memref<8x8x128xf32, #tpu.memory_space<vmem>>, vector<8x1x128xf32>
    %15 = vector.shape_cast %14 : vector<8x1x128xf32> to vector<8x128xf32>
    %16 = arith.negf %15 : vector<8x128xf32>
    %17 = math.exp %16 : vector<8x128xf32>
    %cst = arith.constant 1.000000e+00 : f32
    %18 = vector.broadcast %cst : f32 to vector<8x128xf32>
    %19 = arith.addf %18, %17 : vector<8x128xf32>
    %20 = arith.divf %18, %19 : vector<8x128xf32>
    %c0_17 = arith.constant 0 : index
    %c1_18 = arith.constant 1 : index
    %c0_19 = arith.constant 0 : index
    %21 = vector.load %arg2[%c0_17, %c1_18, %c0_19] : memref<8x8x128xf32, #tpu.memory_space<vmem>>, vector<8x1x128xf32>
    %22 = vector.shape_cast %21 : vector<8x1x128xf32> to vector<8x128xf32>
    %23 = arith.negf %22 : vector<8x128xf32>
    %24 = math.exp %23 : vector<8x128xf32>
    %cst_20 = arith.constant 1.000000e+00 : f32
    %25 = vector.broadcast %cst_20 : f32 to vector<8x128xf32>
    %26 = arith.addf %25, %24 : vector<8x128xf32>
    %27 = arith.divf %25, %26 : vector<8x128xf32>
    %c0_21 = arith.constant 0 : index
    %c2_22 = arith.constant 2 : index
    %c0_23 = arith.constant 0 : index
    %28 = vector.load %arg2[%c0_21, %c2_22, %c0_23] : memref<8x8x128xf32, #tpu.memory_space<vmem>>, vector<8x1x128xf32>
    %29 = vector.shape_cast %28 : vector<8x1x128xf32> to vector<8x128xf32>
    %cst_24 = arith.constant 5.000000e-01 : f32
    %30 = vector.broadcast %cst_24 : f32 to vector<8x128xf32>
    %31 = arith.mulf %30, %29 : vector<8x128xf32>
    %32 = math.exp %31 : vector<8x128xf32>
    %c0_25 = arith.constant 0 : index
    %c3_26 = arith.constant 3 : index
    %c0_27 = arith.constant 0 : index
    %33 = vector.load %arg2[%c0_25, %c3_26, %c0_27] : memref<8x8x128xf32, #tpu.memory_space<vmem>>, vector<8x1x128xf32>
    %34 = vector.shape_cast %33 : vector<8x1x128xf32> to vector<8x128xf32>
    %cst_28 = arith.constant 5.000000e-01 : f32
    %35 = vector.broadcast %cst_28 : f32 to vector<8x128xf32>
    %36 = arith.mulf %35, %34 : vector<8x128xf32>
    %37 = math.exp %36 : vector<8x128xf32>
    %c0_29 = arith.constant 0 : index
    %c4_30 = arith.constant 4 : index
    %c0_31 = arith.constant 0 : index
    %38 = vector.load %arg2[%c0_29, %c4_30, %c0_31] : memref<8x8x128xf32, #tpu.memory_space<vmem>>, vector<8x1x128xf32>
    %39 = vector.shape_cast %38 : vector<8x1x128xf32> to vector<8x128xf32>
    %40 = arith.negf %39 : vector<8x128xf32>
    %41 = math.exp %40 : vector<8x128xf32>
    %cst_32 = arith.constant 1.000000e+00 : f32
    %42 = vector.broadcast %cst_32 : f32 to vector<8x128xf32>
    %43 = arith.addf %42, %41 : vector<8x128xf32>
    %44 = arith.divf %42, %43 : vector<8x128xf32>
    %45 = arith.subf %20, %5 : vector<8x128xf32>
    %46 = arith.subf %27, %7 : vector<8x128xf32>
    %47 = arith.subf %32, %9 : vector<8x128xf32>
    %48 = arith.subf %37, %11 : vector<8x128xf32>
    %49 = arith.mulf %45, %45 : vector<8x128xf32>
    %50 = arith.mulf %46, %46 : vector<8x128xf32>
    %51 = arith.addf %49, %50 : vector<8x128xf32>
    %52 = arith.mulf %47, %47 : vector<8x128xf32>
    %53 = arith.addf %51, %52 : vector<8x128xf32>
    %54 = arith.mulf %48, %48 : vector<8x128xf32>
    %55 = arith.addf %53, %54 : vector<8x128xf32>
    %56 = arith.mulf %1, %55 : vector<8x128xf32>
    %57 = arith.mulf %44, %1 : vector<8x128xf32>
    %58 = math.log %57 : vector<8x128xf32>
    %cst_33 = arith.constant -1.000000e+02 : f32
    %59 = vector.broadcast %cst_33 : f32 to vector<8x128xf32>
    %60 = arith.maximumf %58, %59 : vector<8x128xf32>
    %61 = arith.mulf %13, %60 : vector<8x128xf32>
    %cst_34 = arith.constant 1.000000e+00 : f32
    %62 = vector.broadcast %cst_34 : f32 to vector<8x128xf32>
    %63 = arith.subf %62, %13 : vector<8x128xf32>
    %cst_35 = arith.constant 1.000000e+00 : f32
    %64 = vector.broadcast %cst_35 : f32 to vector<8x128xf32>
    %65 = arith.subf %64, %57 : vector<8x128xf32>
    %66 = math.log %65 : vector<8x128xf32>
    %cst_36 = arith.constant -1.000000e+02 : f32
    %67 = vector.broadcast %cst_36 : f32 to vector<8x128xf32>
    %68 = arith.maximumf %66, %67 : vector<8x128xf32>
    %69 = arith.mulf %63, %68 : vector<8x128xf32>
    %70 = arith.addf %61, %69 : vector<8x128xf32>
    %cst_37 = arith.constant 0.000000e+00 : f32
    %71 = vector.broadcast %cst_37 : f32 to vector<8x128xf32>
    %72 = arith.subf %71, %70 : vector<8x128xf32>
    %73 = arith.mulf %44, %3 : vector<8x128xf32>
    %cst_38 = arith.constant 1.000000e+00 : f32
    %74 = vector.broadcast %cst_38 : f32 to vector<8x128xf32>
    %75 = arith.subf %74, %73 : vector<8x128xf32>
    %76 = math.log %75 : vector<8x128xf32>
    %cst_39 = arith.constant -1.000000e+02 : f32
    %77 = vector.broadcast %cst_39 : f32 to vector<8x128xf32>
    %78 = arith.maximumf %76, %77 : vector<8x128xf32>
    %cst_40 = arith.constant 0.000000e+00 : f32
    %79 = vector.broadcast %cst_40 : f32 to vector<8x128xf32>
    %80 = arith.subf %79, %78 : vector<8x128xf32>
    %cst_41 = arith.constant 0.000000e+00 : f32
    %81 = vector.broadcast %cst_41 : f32 to vector<8x128xf32>
    %c0_42 = arith.constant 0 : index
    %c5_43 = arith.constant 5 : index
    %c0_44 = arith.constant 0 : index
    %82 = vector.load %arg2[%c0_42, %c5_43, %c0_44] : memref<8x8x128xf32, #tpu.memory_space<vmem>>, vector<8x1x128xf32>
    %83 = vector.shape_cast %82 : vector<8x1x128xf32> to vector<8x128xf32>
    %84 = arith.negf %83 : vector<8x128xf32>
    %85 = math.exp %84 : vector<8x128xf32>
    %cst_45 = arith.constant 1.000000e+00 : f32
    %86 = vector.broadcast %cst_45 : f32 to vector<8x128xf32>
    %87 = arith.addf %86, %85 : vector<8x128xf32>
    %88 = arith.divf %86, %87 : vector<8x128xf32>
    %c7 = arith.constant 7 : index
    %c0_46 = arith.constant 0 : index
    %c0_47 = arith.constant 0 : index
    %89 = vector.load %arg3[%c7, %c0_46, %c0_47] : memref<10x8x128xf32, #tpu.memory_space<vmem>>, vector<1x8x128xf32>
    %90 = vector.shape_cast %89 : vector<1x8x128xf32> to vector<8x128xf32>
    %91 = math.log %88 : vector<8x128xf32>
    %cst_48 = arith.constant -1.000000e+02 : f32
    %92 = vector.broadcast %cst_48 : f32 to vector<8x128xf32>
    %93 = arith.maximumf %91, %92 : vector<8x128xf32>
    %94 = arith.mulf %90, %93 : vector<8x128xf32>
    %cst_49 = arith.constant 1.000000e+00 : f32
    %95 = vector.broadcast %cst_49 : f32 to vector<8x128xf32>
    %96 = arith.subf %95, %90 : vector<8x128xf32>
    %cst_50 = arith.constant 1.000000e+00 : f32
    %97 = vector.broadcast %cst_50 : f32 to vector<8x128xf32>
    %98 = arith.subf %97, %88 : vector<8x128xf32>
    %99 = math.log %98 : vector<8x128xf32>
    %cst_51 = arith.constant -1.000000e+02 : f32
    %100 = vector.broadcast %cst_51 : f32 to vector<8x128xf32>
    %101 = arith.maximumf %99, %100 : vector<8x128xf32>
    %102 = arith.mulf %96, %101 : vector<8x128xf32>
    %103 = arith.addf %94, %102 : vector<8x128xf32>
    %104 = arith.subf %81, %103 : vector<8x128xf32>
    %c0_52 = arith.constant 0 : index
    %c6_53 = arith.constant 6 : index
    %c0_54 = arith.constant 0 : index
    %105 = vector.load %arg2[%c0_52, %c6_53, %c0_54] : memref<8x8x128xf32, #tpu.memory_space<vmem>>, vector<8x1x128xf32>
    %106 = vector.shape_cast %105 : vector<8x1x128xf32> to vector<8x128xf32>
    %107 = arith.negf %106 : vector<8x128xf32>
    %108 = math.exp %107 : vector<8x128xf32>
    %cst_55 = arith.constant 1.000000e+00 : f32
    %109 = vector.broadcast %cst_55 : f32 to vector<8x128xf32>
    %110 = arith.addf %109, %108 : vector<8x128xf32>
    %111 = arith.divf %109, %110 : vector<8x128xf32>
    %c8 = arith.constant 8 : index
    %c0_56 = arith.constant 0 : index
    %c0_57 = arith.constant 0 : index
    %112 = vector.load %arg3[%c8, %c0_56, %c0_57] : memref<10x8x128xf32, #tpu.memory_space<vmem>>, vector<1x8x128xf32>
    %113 = vector.shape_cast %112 : vector<1x8x128xf32> to vector<8x128xf32>
    %114 = math.log %111 : vector<8x128xf32>
    %cst_58 = arith.constant -1.000000e+02 : f32
    %115 = vector.broadcast %cst_58 : f32 to vector<8x128xf32>
    %116 = arith.maximumf %114, %115 : vector<8x128xf32>
    %117 = arith.mulf %113, %116 : vector<8x128xf32>
    %cst_59 = arith.constant 1.000000e+00 : f32
    %118 = vector.broadcast %cst_59 : f32 to vector<8x128xf32>
    %119 = arith.subf %118, %113 : vector<8x128xf32>
    %cst_60 = arith.constant 1.000000e+00 : f32
    %120 = vector.broadcast %cst_60 : f32 to vector<8x128xf32>
    %121 = arith.subf %120, %111 : vector<8x128xf32>
    %122 = math.log %121 : vector<8x128xf32>
    %cst_61 = arith.constant -1.000000e+02 : f32
    %123 = vector.broadcast %cst_61 : f32 to vector<8x128xf32>
    %124 = arith.maximumf %122, %123 : vector<8x128xf32>
    %125 = arith.mulf %119, %124 : vector<8x128xf32>
    %126 = arith.addf %117, %125 : vector<8x128xf32>
    %127 = arith.subf %104, %126 : vector<8x128xf32>
    %c0_62 = arith.constant 0 : index
    %c7_63 = arith.constant 7 : index
    %c0_64 = arith.constant 0 : index
    %128 = vector.load %arg2[%c0_62, %c7_63, %c0_64] : memref<8x8x128xf32, #tpu.memory_space<vmem>>, vector<8x1x128xf32>
    %129 = vector.shape_cast %128 : vector<8x1x128xf32> to vector<8x128xf32>
    %130 = arith.negf %129 : vector<8x128xf32>
    %131 = math.exp %130 : vector<8x128xf32>
    %cst_65 = arith.constant 1.000000e+00 : f32
    %132 = vector.broadcast %cst_65 : f32 to vector<8x128xf32>
    %133 = arith.addf %132, %131 : vector<8x128xf32>
    %134 = arith.divf %132, %133 : vector<8x128xf32>
    %c9 = arith.constant 9 : index
    %c0_66 = arith.constant 0 : index
    %c0_67 = arith.constant 0 : index
    %135 = vector.load %arg3[%c9, %c0_66, %c0_67] : memref<10x8x128xf32, #tpu.memory_space<vmem>>, vector<1x8x128xf32>
    %136 = vector.shape_cast %135 : vector<1x8x128xf32> to vector<8x128xf32>
    %137 = math.log %134 : vector<8x128xf32>
    %cst_68 = arith.constant -1.000000e+02 : f32
    %138 = vector.broadcast %cst_68 : f32 to vector<8x128xf32>
    %139 = arith.maximumf %137, %138 : vector<8x128xf32>
    %140 = arith.mulf %136, %139 : vector<8x128xf32>
    %cst_69 = arith.constant 1.000000e+00 : f32
    %141 = vector.broadcast %cst_69 : f32 to vector<8x128xf32>
    %142 = arith.subf %141, %136 : vector<8x128xf32>
    %cst_70 = arith.constant 1.000000e+00 : f32
    %143 = vector.broadcast %cst_70 : f32 to vector<8x128xf32>
    %144 = arith.subf %143, %134 : vector<8x128xf32>
    %145 = math.log %144 : vector<8x128xf32>
    %cst_71 = arith.constant -1.000000e+02 : f32
    %146 = vector.broadcast %cst_71 : f32 to vector<8x128xf32>
    %147 = arith.maximumf %145, %146 : vector<8x128xf32>
    %148 = arith.mulf %142, %147 : vector<8x128xf32>
    %149 = arith.addf %140, %148 : vector<8x128xf32>
    %150 = arith.subf %127, %149 : vector<8x128xf32>
    %151 = arith.mulf %1, %150 : vector<8x128xf32>
    %cst_72 = arith.constant 1.000000e+00 : f32
    %152 = vector.broadcast %cst_72 : f32 to vector<8x128xf32>
    %153 = arith.mulf %152, %56 : vector<8x128xf32>
    %cst_73 = arith.constant 5.000000e+00 : f32
    %154 = vector.broadcast %cst_73 : f32 to vector<8x128xf32>
    %155 = arith.mulf %154, %72 : vector<8x128xf32>
    %156 = arith.addf %153, %155 : vector<8x128xf32>
    %cst_74 = arith.constant 5.000000e-01 : f32
    %157 = vector.broadcast %cst_74 : f32 to vector<8x128xf32>
    %158 = arith.mulf %157, %80 : vector<8x128xf32>
    %159 = arith.addf %156, %158 : vector<8x128xf32>
    %cst_75 = arith.constant 1.000000e+00 : f32
    %160 = vector.broadcast %cst_75 : f32 to vector<8x128xf32>
    %161 = arith.mulf %160, %151 : vector<8x128xf32>
    %162 = arith.addf %159, %161 : vector<8x128xf32>
    %c0_76 = arith.constant 0 : index
    %c0_77 = arith.constant 0 : index
    %c0_78 = arith.constant 0 : index
    %163 = vector.load %arg4[%c0_76, %c0_77, %c0_78] : memref<1x8x128xf32, #tpu.memory_space<vmem>>, vector<1x8x128xf32>
    %164 = vector.shape_cast %163 : vector<1x8x128xf32> to vector<8x128xf32>
    %165 = vector.shape_cast %162 : vector<8x128xf32> to vector<1x8x128xf32>
    tpu.vector_store %arg4[%c0_76, %c0_77, %c0_78], %165 {strides = array<i32>} : memref<1x8x128xf32, #tpu.memory_space<vmem>>, vector<1x8x128xf32>,
    return
  }
  func.func @transform_0(%arg0: i32, %arg1: i32) -> (i32, i32, i32) {
    %c0_i32 = arith.constant 0 : i32
    %c0_i32_0 = arith.constant 0 : i32
    return %arg0, %c0_i32, %arg1 : i32, i32, i32
  }
  func.func @transform_1(%arg0: i32, %arg1: i32) -> (i32, i32, i32) {
    %c0_i32 = arith.constant 0 : i32
    %c0_i32_0 = arith.constant 0 : i32
    return %c0_i32, %arg0, %arg1 : i32, i32, i32
  }
  func.func @transform_2(%arg0: i32, %arg1: i32) -> (i32, i32, i32) {
    %c0_i32 = arith.constant 0 : i32
    %c0_i32_0 = arith.constant 0 : i32
    return %arg0, %c0_i32, %arg1 : i32, i32, i32
  }
}

</mosaic_0001>

<bundles_post_ra>
// kernel: _lambda_.1
= control target key start
LH: loop header
LB: loop body
LE: loop exit
PB: predicated region body
PF: predicated region fallthrough
CT: control target
= control target key end

     0   :  { %vm417_vm0 = vcmask 1041409   ;;  %vm420_vm1 = vcmask 1042434   ;;  %vm423_vm2 = vcmask 1043459   ;;  %vm426_vm3 = vcmask 1044484   ;;  %s2334_s0 = inlined_call_operand.vmem [shape: f32[8,8,128], index: 0, kind: input, shape index: {}]   ;;  %s2335_s1 = inlined_call_operand.vmem [shape: f32[10,8,128], index: 1, kind: input, shape index: {}]   ;;  %s2336_s2 = inlined_call_operand.vmem [shape: f32[1,8,128], index: 2, kind: output, shape index: {}]  }
   0x1   :  { %v24_v0 = vld [vmem:[%s2334_s0] sm:$0x1]  ;;  %v25_v1 = vld [vmem:[%s2334_s0 + $0x8] sm:$0x1]  ;;  %v26_v2 = vld [vmem:[%s2334_s0 + $0x10] sm:$0x1] }
   0x2   :  { %v27_v3 = vld [vmem:[%s2334_s0 + $0x18] sm:$0x1]  ;;  %v1176_v4 = vmul.f32 -1.442695, %v24_v0  ;;  %v28_v5 = vld [vmem:[%s2334_s0 + $0x20] sm:$0x1] }
   0x3   :  { %v1177_v6 = vmul.f32 -1.442695, %v25_v1  ;;  %v29_v7 = vld [vmem:[%s2334_s0 + $0x28] sm:$0x1]  ;;  %v1178_v8 = vmul.f32 -1.442695, %v26_v2 }
   0x4   :  { %v30_v9 = vld [vmem:[%s2334_s0 + $0x30] sm:$0x1]  ;;  %v1179_v10 = vmul.f32 -1.442695, %v27_v3  ;;  %v31_v11 = vld [vmem:[%s2334_s0 + $0x38] sm:$0x1]  ;;  %1227 = vpow2.f32 %v1176_v4 }
   0x5   :  { %v1180_v12 = vmul.f32 -1.442695, %v28_v5  ;;  %1229 = vpow2.f32 %v1177_v6  ;;  %v1181_v13 = vmul.f32 -1.442695, %v29_v7  ;;  %v80_v14 = vld [vmem:[%s2334_s0 + $0x1] sm:$0x1] }
   0x6   :  { %1231 = vpow2.f32 %v1178_v8  ;;  %v1182_v15 = vmul.f32 -1.442695, %v30_v9  ;;  %v81_v16 = vld [vmem:[%s2334_s0 + $0x9] sm:$0x1]  ;;  %v1183_v17 = vmul.f32 -1.442695, %v31_v11 }
   0x7   :  { %1233 = vpow2.f32 %v1179_v10  ;;  %v82_v18 = vld [vmem:[%s2334_s0 + $0x11] sm:$0x1]  ;;  %v83_v19 = vld [vmem:[%s2334_s0 + $0x19] sm:$0x1]  ;;  %v1184_v20 = vmul.f32 -1.442695, %v80_v14 }
   0x8   :  { %1235 = vpow2.f32 %v1180_v12  ;;  %v84_v21 = vld [vmem:[%s2334_s0 + $0x21] sm:$0x1]  ;;  %v1185_v22 = vmul.f32 -1.442695, %v81_v16  ;;  %v85_v23 = vld [vmem:[%s2334_s0 + $0x29] sm:$0x1] }
   0x9   :  { %1237 = vpow2.f32 %v1181_v13  ;;  %v1186_v24 = vmul.f32 -1.442695, %v82_v18  ;;  %v86_v25 = vld [vmem:[%s2334_s0 + $0x31] sm:$0x1]  ;;  %v1187_v26 = vmul.f32 -1.442695, %v83_v19 }
   0xa   :  { %1239 = vpow2.f32 %v1182_v15  ;;  %v87_v27 = vld [vmem:[%s2334_s0 + $0x39] sm:$0x1]  ;;  %v1188_v28 = vmul.f32 -1.442695, %v84_v21  ;;  %v1189_v29 = vmul.f32 -1.442695, %v85_v23 }
   0xb   :  { %1241 = vpow2.f32 %v1183_v17  ;;  %v1190_v30 = vmul.f32 -1.442695, %v86_v25  ;;  %v1191_v31 = vmul.f32 -1.442695, %v87_v27  ;;  %v1662_v38 = vld [vmem:[%s2335_s1 + $0x10] sm:$0xff]  ;;  %vm429_vm4 = vcmask 1045509  }
   0xc   :  { %1243 = vpow2.f32 %v1184_v20  ;;  %v136_v44 = vld [vmem:[%s2334_s0 + $0x2] sm:$0x1]  ;;  %v137_v45 = vld [vmem:[%s2334_s0 + $0xa] sm:$0x1]  ;;  %v138_v48 = vld [vmem:[%s2334_s0 + $0x12] sm:$0x1] }
   0xd   :  { %1245 = vpow2.f32 %v1185_v22  ;;  %v139_v49 = vld [vmem:[%s2334_s0 + $0x1a] sm:$0x1]  ;;  %v257_v50 = vrot.slane %v1662_v38, 1  ;;  %v140_v53 = vld [vmem:[%s2334_s0 + $0x22] sm:$0x1]  ;;  %v258_v54 = vrot.slane %v1662_v38, 2 }
   0xe   :  { %1247 = vpow2.f32 %v1186_v24  ;;  %v259_v55 = vrot.slane %v1662_v38, 3  ;;  %v141_v58 = vld [vmem:[%s2334_s0 + $0x2a] sm:$0x1]  ;;  %v144_v59 = vmul.f32 0.5, %v136_v44  ;;  %v145_v60 = vmul.f32 0.5, %v137_v45 }
   0xf   :  { %1249 = vpow2.f32 %v1187_v26  ;;  %v146_v63 = vmul.f32 0.5, %v138_v48  ;;  %v147_v0 = vmul.f32 0.5, %v139_v49  ;;  %v142_v3 = vld [vmem:[%s2334_s0 + $0x32] sm:$0x1]  ;;  %v148_v4 = vmul.f32 0.5, %v140_v53 }
  0x10   :  { %1251 = vpow2.f32 %v1188_v28  ;;  %v260_v5 = vrot.slane %v1662_v38, 4  ;;  %v143_v8 = vld [vmem:[%s2334_s0 + $0x3a] sm:$0x1]  ;;  %v149_v9 = vmul.f32 0.5, %v141_v58  ;;  %v168_v10 = vld [vmem:[%s2334_s0 + $0x3] sm:$0x1] }
  0x11   :  { %v1228_v32 = vpop.eup %1227  ;;  %1253 = vpow2.f32 %v1189_v29  ;;  %v152_v13 = vmul.f32 1.442695, %v144_v59  ;;  %v154_v14 = vmul.f32 1.442695, %v145_v60  ;;  %v169_v15 = vld [vmem:[%s2334_s0 + $0xb] sm:$0x1] }
  0x12   :  { %v1230_v33 = vpop.eup %1229  ;;  %1255 = vpow2.f32 %v1190_v30  ;;  %v56_v36 = vadd.f32 1.0, %v1228_v32  ;;  %v156_v18 = vmul.f32 1.442695, %v146_v63  ;;  %v158_v19 = vmul.f32 1.442695, %v147_v0 }
  0x13   :  { %v1232_v34 = vpop.eup %1231  ;;  %1257 = vpow2.f32 %v1191_v31  ;;  %v57_v39 = vadd.f32 1.0, %v1230_v33  ;;  %v150_v22 = vmul.f32 0.5, %v142_v3  ;;  %v160_v23 = vmul.f32 1.442695, %v148_v4  ;;  %v170_v24 = vld [vmem:[%s2334_s0 + $0x13] sm:$0x1] }
  0x14   :  { %v1234_v35 = vpop.eup %1233  ;;  %v58_v41 = vadd.f32 1.0, %v1232_v34  ;;  %1259 = vrcp.f32 %v56_v36  ;;  %v151_v26 = vmul.f32 0.5, %v143_v8  ;;  %v171_v27 = vld [vmem:[%s2334_s0 + $0x1b] sm:$0x1]  ;;  %v172_v28 = vld [vmem:[%s2334_s0 + $0x23] sm:$0x1] }
  0x15   :  { %v1236_v37 = vpop.eup %1235  ;;  %v59_v43 = vadd.f32 1.0, %v1234_v35  ;;  %1261 = vrcp.f32 %v57_v39  ;;  %v173_v30 = vld [vmem:[%s2334_s0 + $0x2b] sm:$0x1]  ;;  %v174_v31 = vld [vmem:[%s2334_s0 + $0x33] sm:$0x1]  ;;  %v176_v32 = vmul.f32 0.5, %v168_v10 }
  0x16   :  { %v1238_v40 = vpop.eup %1237  ;;  %v60_v47 = vadd.f32 1.0, %v1236_v37  ;;  %1263 = vrcp.f32 %v58_v41  ;;  %v175_v34 = vld [vmem:[%s2334_s0 + $0x3b] sm:$0x1]  ;;  %v177_v35 = vmul.f32 0.5, %v169_v15  ;;  %v178_v36 = vmul.f32 0.5, %v170_v24 }
  0x17   :  { %v1240_v42 = vpop.eup %1239  ;;  %v61_v52 = vadd.f32 1.0, %v1238_v40  ;;  %1265 = vrcp.f32 %v59_v43  ;;  %v1716_v37 = vmul.f32 1.442695, %v149_v9  ;;  %v179_v39 = vmul.f32 0.5, %v171_v27  ;;  %v200_v48 = vld [vmem:[%s2334_s0 + $0x4] sm:$0x1] }
  0x18   :  { %v1242_v46 = vpop.eup %1241  ;;  %v62_v57 = vadd.f32 1.0, %v1240_v42  ;;  %1267 = vrcp.f32 %v60_v47  ;;  %v180_v40 = vmul.f32 0.5, %v172_v28  ;;  %v1718_v42 = vmul.f32 1.442695, %v150_v22  ;;  %v201_v49 = vld [vmem:[%s2334_s0 + $0xc] sm:$0x1] }
  0x19   :  { %v1244_v51 = vpop.eup %1243  ;;  %v63_v62 = vadd.f32 1.0, %v1242_v46  ;;  %1269 = vrcp.f32 %v61_v52  ;;  %v1720_v43 = vmul.f32 1.442695, %v151_v26  ;;  %v181_v44 = vmul.f32 0.5, %v173_v30  ;;  %v202_v60 = vld [vmem:[%s2334_s0 + $0x14] sm:$0x1] }
  0x1a   :  { %v1246_v56 = vpop.eup %1245  ;;  %v112_v2 = vadd.f32 1.0, %v1244_v51  ;;  %1271 = vrcp.f32 %v62_v57  ;;  %v182_v46 = vmul.f32 0.5, %v174_v31  ;;  %v183_v47 = vmul.f32 0.5, %v175_v34  ;;  %v203_v63 = vld [vmem:[%s2334_s0 + $0x1c] sm:$0x1]  ;;  %v1775_v28 = vld [vmem:[%s2335_s1 + $0x20] sm:$0xff] }
  0x1b   :  { %v1248_v61 = vpop.eup %1247  ;;  %v113_v7 = vadd.f32 1.0, %v1246_v56  ;;  %1273 = vrcp.f32 %v63_v62  ;;  %v1728_v52 = vmul.f32 1.442695, %v176_v32  ;;  %v1730_v53 = vmul.f32 1.442695, %v177_v35 }
  0x1c   :  { %v1250_v1 = vpop.eup %1249  ;;  %v114_v12 = vadd.f32 1.0, %v1248_v61  ;;  %1275 = vrcp.f32 %v112_v2  ;;  %v1732_v56 = vmul.f32 1.442695, %v178_v36  ;;  %v1734_v58 = vmul.f32 1.442695, %v179_v39  ;;  %v1749_v2 = vld [vmem:[%s2335_s1 + $0x18] sm:$0xff] }
  0x1d   :  { %v1252_v6 = vpop.eup %1251  ;;  %v115_v17 = vadd.f32 1.0, %v1250_v1  ;;  %1277 = vrcp.f32 %v113_v7  ;;  %v1736_v59 = vmul.f32 1.442695, %v180_v40  ;;  %v1741_v62 = vmul.f32 1.442695, %v181_v44  ;;  %v1792_v44 = vld [vmem:[%s2335_s1 + $0x28] sm:$0xff] }
  0x1e   :  { %v1254_v11 = vpop.eup %1253  ;;  %v116_v21 = vadd.f32 1.0, %v1252_v6  ;;  %1279 = vrcp.f32 %v114_v12  ;;  %v1192_v0 = vmul.f32 -1.442695, %v200_v48  ;;  %v1751_v3 = vmul.f32 1.442695, %v182_v46 }
  0x1f   :  { %v1256_v16 = vpop.eup %1255  ;;  %v117_v25 = vadd.f32 1.0, %v1254_v11  ;;  %1281 = vrcp.f32 %v115_v17  ;;  %v204_v4 = vld [vmem:[%s2334_s0 + $0x24] sm:$0x1]  ;;  %v1193_v6 = vmul.f32 -1.442695, %v201_v49  ;;  %v261_v17 = vrot.slane %v1662_v38, 5 }
  0x20   :  { %v1258_v20 = vpop.eup %1257  ;;  %v118_v29 = vadd.f32 1.0, %v1256_v16  ;;  %1283 = vrcp.f32 %v116_v21  ;;  %v205_v8 = vld [vmem:[%s2334_s0 + $0x2c] sm:$0x1]  ;;  %v206_v9 = vld [vmem:[%s2334_s0 + $0x34] sm:$0x1]  ;;  %v263_v22 = vrot.slane %v1662_v38, 7 }
  0x21   :  { %v119_v33 = vadd.f32 1.0, %v1258_v20  ;;  %v1260_v41 = vpop.eup %1259  ;;  %1285 = vrcp.f32 %v117_v25  ;;  %v1194_v10 = vmul.f32 -1.442695, %v202_v60  ;;  %v1762_v12 = vmul.f32 1.442695, %v183_v47 }
  0x22   :  { %v1262_v45 = vpop.eup %1261  ;;  %1287 = vrcp.f32 %v118_v29  ;;  %v1196_v16 = vmul.f32 -1.442695, %v204_v4  ;;  %v1197_v20 = vmul.f32 -1.442695, %v205_v8  ;;  %v1198_v21 = vmul.f32 -1.442695, %v206_v9 }
  0x23   :  { %v1264_v51 = vpop.eup %1263  ;;  %1289 = vrcp.f32 %v119_v33  ;;  %v272_v25 = vsub.f32 %v1260_v41, %v1662_v38  ;;  %v281_v26 = vrot.slane %v1749_v2, 1  ;;  %v273_v29 = vsub.f32 %v1262_v45, %v257_v50 }
  0x24   :  { %v1266_v57 = vpop.eup %1265  ;;  %1291 = vpow2.f32 %v152_v13  ;;  %v207_v13 = vld [vmem:[%s2334_s0 + $0x3c] sm:$0x1]  ;;  %v282_v30 = vrot.slane %v1749_v2, 2  ;;  %v283_v31 = vrot.slane %v1749_v2, 3  ;;  %v274_v33 = vsub.f32 %v1264_v51, %v258_v54 }
  0x25   :  { %v1268_v61 = vpop.eup %1267  ;;  %1293 = vpow2.f32 %v154_v14  ;;  %v1195_v14 = vmul.f32 -1.442695, %v203_v63  ;;  %v1199_v24 = vmul.f32 -1.442695, %v207_v13  ;;  %v284_v34 = vrot.slane %v1749_v2, 4 }
  0x26   :  { %v1270_v1 = vpop.eup %1269  ;;  %1295 = vpow2.f32 %v156_v18  ;;  %v262_v18 = vrot.slane %v1662_v38, 6  ;;  %v285_v35 = vrot.slane %v1749_v2, 5  ;;  %v275_v39 = vsub.f32 %v1266_v57, %v259_v55 }
  0x27   :  { %v1272_v7 = vpop.eup %1271  ;;  %1297 = vpow2.f32 %v158_v19  ;;  %v286_v50 = vrot.slane %v1749_v2, 6  ;;  %v287_v40 = vrot.slane %v1749_v2, 7  ;;  %v276_v54 = vsub.f32 %v1268_v61, %v260_v5 }
  0x28   :  { %v1274_v11 = vpop.eup %1273  ;;  %1299 = vpow2.f32 %v160_v23  ;;  %v305_v45 = vrot.slane %v1775_v28, 1  ;;  %v306_v46 = vrot.slane %v1775_v28, 2  ;;  %v277_v55 = vsub.f32 %v1270_v1, %v261_v17 }
  0x29   :  { %v1276_v15 = vpop.eup %1275  ;;  %1301 = vpow2.f32 %v1192_v0  ;;  %v307_v48 = vrot.slane %v1775_v28, 3  ;;  %v308_v49 = vrot.slane %v1775_v28, 4  ;;  %v278_v57 = vsub.f32 %v1272_v7, %v262_v18 }
  0x2a   :  { %v1278_v19 = vpop.eup %1277  ;;  %1303 = vpow2.f32 %v1193_v6  ;;  %v309_v60 = vrot.slane %v1775_v28, 5  ;;  %v310_v38 = vrot.slane %v1775_v28, 6  ;;  %v279_v61 = vsub.f32 %v1274_v11, %v263_v22 }
  0x2b   :  { %v1280_v23 = vpop.eup %1279  ;;  %1305 = vpow2.f32 %v1194_v10  ;;  %v311_v63 = vrot.slane %v1775_v28, 7  ;;  %v329_v0 = vrot.slane %v1792_v44, 1  ;;  %v296_v4 = vsub.f32 %v1276_v15, %v1749_v2 }
  0x2c   :  { %v1282_v27 = vpop.eup %1281  ;;  %1307 = vpow2.f32 %v1195_v14  ;;  %v331_v6 = vrot.slane %v1792_v44, 3  ;;  %v297_v8 = vsub.f32 %v1278_v19, %v281_v26  ;;  %v333_v9 = vrot.slane %v1792_v44, 5 }
  0x2d   :  { %v1284_v32 = vpop.eup %1283  ;;  %1309 = vpow2.f32 %v1196_v16  ;;  %v334_v10 = vrot.slane %v1792_v44, 6  ;;  %v298_v13 = vsub.f32 %v1280_v23, %v282_v30  ;;  %v352_v2 = vmul.f32 %v272_v25, %v272_v25 }
  0x2e   :  { %v1286_v36 = vpop.eup %1285  ;;  %1311 = vpow2.f32 %v1197_v20  ;;  %v299_v15 = vsub.f32 %v1282_v27, %v283_v31  ;;  %v353_v16 = vmul.f32 %v273_v29, %v273_v29  ;;  %v354_v17 = vmul.f32 %v274_v33, %v274_v33 }
  0x2f   :  { %v1288_v41 = vpop.eup %1287  ;;  %1313 = vpow2.f32 %v1198_v21  ;;  %v300_v19 = vsub.f32 %v1284_v32, %v284_v34  ;;  %v355_v20 = vmul.f32 %v275_v39, %v275_v39  ;;  %v356_v21 = vmul.f32 %v276_v54, %v276_v54 }
  0x30   :  { %v1290_v47 = vpop.eup %1289  ;;  %1315 = vpow2.f32 %v1199_v24  ;;  %v357_v23 = vmul.f32 %v277_v55, %v277_v55  ;;  %v358_v24 = vmul.f32 %v278_v57, %v278_v57  ;;  %v1823_v27 = vmul.f32 %v279_v61, %v279_v61 }
  0x31   :  { %v1292_v51 = vpop.eup %1291  ;;  %1317 = vpow2.f32 %v1716_v37  ;;  %v330_v37 = vrot.slane %v1792_v44, 2  ;;  %v303_v30 = vsub.f32 %v1290_v47, %v287_v40  ;;  %v360_v31 = vmul.f32 %v296_v4, %v296_v4 }
  0x32   :  { %v1294_v5 = vpop.eup %1293  ;;  %1319 = vpow2.f32 %v1718_v42  ;;  %v332_v42 = vrot.slane %v1792_v44, 4  ;;  %v361_v33 = vmul.f32 %v297_v8, %v297_v8  ;;  %v362_v34 = vmul.f32 %v298_v13, %v298_v13 }
  0x33   :  { %v1806_v1 = vpop.eup %1295  ;;  %1321 = vpow2.f32 %v1720_v43  ;;  %v335_v43 = vrot.slane %v1792_v44, 7  ;;  %v363_v39 = vmul.f32 %v299_v15, %v299_v15  ;;  %v364_v40 = vmul.f32 %v300_v19, %v300_v19 }
  0x34   :  { %v1812_v7 = vpop.eup %1297  ;;  %1323 = vpow2.f32 %v1728_v52  ;;  %v301_v52 = vsub.f32 %v1286_v36, %v285_v35  ;;  %v320_v36 = vsub.f32 %v1292_v51, %v1775_v28  ;;  %v367_v51 = vmul.f32 %v303_v30, %v303_v30 }
  0x35   :  { %v1300_v11 = vpop.eup %1299  ;;  %1325 = vpow2.f32 %v1730_v53  ;;  %v302_v53 = vsub.f32 %v1288_v41, %v286_v50  ;;  %v369_v15 = vadd.f32 %v361_v33, %v353_v16  ;;  %v371_v19 = vadd.f32 %v363_v39, %v355_v20 }
  0x36   :  { %v1302_v14 = vpop.eup %1301  ;;  %1327 = vpow2.f32 %v1732_v56  ;;  %v324_v13 = vsub.f32 %v1300_v11, %v308_v49  ;;  %v372_v49 = vadd.f32 %v364_v40, %v356_v21  ;;  %v375_v20 = vadd.f32 %v367_v51, %v1823_v27 }
  0x37   :  { %v1304_v18 = vpop.eup %1303  ;;  %1329 = vpow2.f32 %v1734_v58  ;;  %v232_v25 = vadd.f32 1.0, %v1302_v14  ;;  %v366_v55 = vmul.f32 %v302_v53, %v302_v53  ;;  %vm432_vm5 = vcmask 1046534  }
  0x38   :  { %v1306_v22 = vpop.eup %1305  ;;  %1331 = vpow2.f32 %v1736_v59  ;;  %v233_v56 = vadd.f32 1.0, %v1304_v18  ;;  %v380_v53 = vmul.f32 %v324_v13, %v324_v13  ;;  %vm435_vm6 = vcmask 1047559  }
  0x39   :  { %v1308_v26 = vpop.eup %1307  ;;  %1333 = vpow2.f32 %v1741_v62  ;;  %v234_v58 = vadd.f32 1.0, %v1306_v22  ;;  %v321_v62 = vsub.f32 %v1294_v5, %v305_v45  ;;  %v323_v45 = vsub.f32 %v1812_v7, %v307_v48 }
  0x3a   :  { %v1310_v29 = vpop.eup %1309  ;;  %1335 = vpow2.f32 %v1751_v3  ;;  %v235_v59 = vadd.f32 1.0, %v1308_v26  ;;  %v365_v3 = vmul.f32 %v301_v52, %v301_v52  ;;  %v368_v5 = vadd.f32 %v360_v31, %v352_v2 }
  0x3b   :  { %v1312_v32 = vpop.eup %1311  ;;  %1337 = vpow2.f32 %v1762_v12  ;;  %v236_v41 = vadd.f32 1.0, %v1310_v29  ;;  %v322_v12 = vsub.f32 %v1806_v1, %v306_v46  ;;  %v370_v1 = vadd.f32 %v362_v34, %v354_v17 }
  0x3c   :  { %v1314_v35 = vpop.eup %1313  ;;  %1339 = vrcp.f32 %v232_v25  ;;  %v237_v47 = vadd.f32 1.0, %v1312_v32  ;;  %v376_v7 = vmul.f32 %v320_v36, %v320_v36  ;;  %v377_v2 = vmul.f32 %v321_v62, %v321_v62 }
  0x3d   :  { %v1316_v50 = vpop.eup %1315  ;;  %1341 = vrcp.f32 %v233_v56  ;;  %v238_v61 = vadd.f32 1.0, %v1314_v35  ;;  %v378_v11 = vmul.f32 %v322_v12, %v322_v12  ;;  %v373_v26 = vadd.f32 %v365_v3, %v357_v23  ;;  %v635_v23 = vld [vmem:[%s2334_s0 + $0xd] sm:$0x1]  ;;  %v1858_v56 = vld [vmem:[%s2335_s1] sm:$0xff] }
  0x3e   :  { %v1318_v54 = vpop.eup %1317  ;;  %1343 = vrcp.f32 %v234_v58  ;;  %v239_v8 = vadd.f32 1.0, %v1316_v50  ;;  %v374_v25 = vadd.f32 %v366_v55, %v358_v24  ;;  %v384_v32 = vadd.f32 %v376_v7, %v368_v5 }
  0x3f   :  { %v1320_v57 = vpop.eup %1319  ;;  %1345 = vrcp.f32 %v235_v59  ;;  %v325_v14 = vsub.f32 %v1318_v54, %v309_v60  ;;  %v379_v60 = vmul.f32 %v323_v45, %v323_v45  ;;  %v385_v58 = vadd.f32 %v377_v2, %v369_v15 }
  0x40   :  { %v1322_v4 = vpop.eup %1321  ;;  %1347 = vrcp.f32 %v236_v41  ;;  %v326_v46 = vsub.f32 %v1320_v57, %v310_v38  ;;  %v634_v38 = vld [vmem:[%s2334_s0 + $0x5] sm:$0x1]  ;;  %v386_v34 = vadd.f32 %v378_v11, %v370_v1  ;;  %v1201_v41 = vmul.f32 -1.442695, %v635_v23  ;;  %v1916_v11 = vld [vmem:[%s2335_s1 + $0x8] sm:$0xff] }
  0x41   :  { %v1324_v18 = vpop.eup %1323  ;;  %1349 = vrcp.f32 %v237_v47  ;;  %v327_v48 = vsub.f32 %v1322_v4, %v311_v63  ;;  %v381_v29 = vmul.f32 %v325_v14, %v325_v14  ;;  %v1867_v35 = vadd.f32 %v379_v60, %v371_v19 }
  0x42   :  { %v1326_v22 = vpop.eup %1325  ;;  %1351 = vrcp.f32 %v238_v61  ;;  %v344_v28 = vsub.f32 %v1324_v18, %v1792_v44  ;;  %v382_v21 = vmul.f32 %v326_v46, %v326_v46  ;;  %v1200_v59 = vmul.f32 -1.442695, %v634_v38 }
  0x43   :  { %v1328_v52 = vpop.eup %1327  ;;  %1353 = vrcp.f32 %v239_v8  ;;  %v345_v63 = vsub.f32 %v1326_v22, %v329_v0  ;;  %v383_v31 = vmul.f32 %v327_v48, %v327_v48  ;;  %v636_v0 = vld [vmem:[%s2334_s0 + $0x15] sm:$0x1]  ;;  %v1873_v50 = vadd.f32 %v381_v29, %v373_v26 }
  0x44   :  { %v1330_v16 = vpop.eup %1329  ;;  %v346_v30 = vsub.f32 %v1328_v52, %v330_v37  ;;  %v1871_v37 = vadd.f32 %v380_v53, %v372_v49  ;;  %v1877_v40 = vadd.f32 %v382_v21, %v374_v25  ;;  %v1202_v47 = vmul.f32 -1.442695, %v636_v0 }
  0x45   :  { %v1332_v17 = vpop.eup %1331  ;;  %v347_v33 = vsub.f32 %v1330_v16, %v331_v6  ;;  %v393_v54 = vmul.f32 %v345_v63, %v345_v63  ;;  %v440_v6 = vrot.slane %v1858_v56, 1  ;;  %v1884_v57 = vadd.f32 %v383_v31, %v375_v20 }
  0x46   :  { %v1334_v24 = vpop.eup %1333  ;;  %v348_v39 = vsub.f32 %v1332_v17, %v332_v42  ;;  %v392_v42 = vmul.f32 %v344_v28, %v344_v28  ;;  %v441_v61 = vrot.slane %v1858_v56, 2  ;;  %v394_v4 = vmul.f32 %v346_v30, %v346_v30 }
  0x47   :  { %v1336_v27 = vpop.eup %1335  ;;  %v349_v55 = vsub.f32 %v1334_v24, %v333_v9  ;;  %v442_v8 = vrot.slane %v1858_v56, 3  ;;  %1355 = vpow2.f32 %v1200_v59  ;;  %v395_v5 = vmul.f32 %v347_v33, %v347_v33 }
  0x48   :  { %v1338_v36 = vpop.eup %1337  ;;  %v350_v51 = vsub.f32 %v1336_v27, %v334_v10  ;;  %v443_v9 = vrot.slane %v1858_v56, 4  ;;  %1357 = vpow2.f32 %v1201_v41  ;;  %v401_v15 = vadd.f32 %v393_v54, %v385_v58 }
  0x49   :  { %v1875_v62 = vpop.eup %1339  ;;  %v444_v18 = vrot.slane %v1858_v56, 5  ;;  %1359 = vpow2.f32 %v1202_v47  ;;  %v396_v1 = vmul.f32 %v348_v39, %v348_v39  ;;  %v445_v19 = vrot.slane %v1858_v56, 6 }
  0x4a   :  { %v1880_v3 = vpop.eup %1341  ;;  %v455_v13 = vmul.f32 %v1875_v62, %v1858_v56  ;;  %v351_v7 = vsub.f32 %v1338_v36, %v335_v43  ;;  %v446_v2 = vrot.slane %v1858_v56, 7  ;;  %v397_v60 = vmul.f32 %v349_v55, %v349_v55 }
  0x4b   :  { %v1887_v12 = vpop.eup %1343  ;;  %v456_v10 = vmul.f32 %v1880_v3, %v440_v6  ;;  %v400_v16 = vadd.f32 %v392_v42, %v384_v32  ;;  %v402_v44 = vadd.f32 %v394_v4, %v386_v34  ;;  %v416_v43 = vrot.slane %v401_v15, 7  ;;  %v637_v42 = vld [vmem:[%s2334_s0 + $0x1d] sm:$0x1] }
  0x4c   :  { %v1892_v45 = vpop.eup %1345  ;;  %v457_v22 = vmul.f32 %v1887_v12, %v441_v61  ;;  %1361 = vlog2.f32 %v455_v13  ;;  %v398_v53 = vmul.f32 %v350_v51, %v350_v51  ;;  %v512_v38 = vsub.f32 1.0, %v455_v13 }
  0x4d   :  { %v1897_v14 = vpop.eup %1347  ;;  %v458_v52 = vmul.f32 %v1892_v45, %v442_v8  ;;  %1363 = vlog2.f32 %v456_v10  ;;  %v513_v28 = vsub.f32 1.0, %v456_v10  ;;  %v571_v63 = vrot.slane %v1916_v11, 1  ;;  %v639_v10 = vld [vmem:[%s2334_s0 + $0x2d] sm:$0x1] }
  0x4e   :  { %v1901_v46 = vpop.eup %1349  ;;  %v459_v26 = vmul.f32 %v1897_v14, %v443_v9  ;;  %1365 = vlog2.f32 %v457_v22  ;;  %v403_v20 = vadd.f32 %v395_v5, %v1867_v35  ;;  %v514_v21 = vsub.f32 1.0, %v457_v22  ;;  %v638_v9 = vld [vmem:[%s2334_s0 + $0x25] sm:$0x1] }
  0x4f   :  { %v1905_v48 = vpop.eup %1351  ;;  %v460_v25 = vmul.f32 %v1901_v46, %v444_v18  ;;  %1367 = vlog2.f32 %v458_v52  ;;  %v572_v23 = vrot.slane %v1916_v11, 2  ;;  %v418_v24 = vsel %vm417_vm0, %v416_v43, %v400_v16  ;;  %v641_v16 = vld [vmem:[%s2334_s0 + $0x3d] sm:$0x1] }
  0x50   :  { %v1911_v49 = vpop.eup %1353  ;;  %v461_v29 = vmul.f32 %v1905_v48, %v445_v19  ;;  %1369 = vlog2.f32 %v459_v26  ;;  %v419_v30 = vrot.slane %v402_v44, 6  ;;  %v515_v31 = vsub.f32 1.0, %v458_v52 }
  0x51   :  { %v462_v17 = vmul.f32 %v1911_v49, %v446_v2  ;;  %1371 = vlog2.f32 %v460_v25  ;;  %v516_v32 = vsub.f32 1.0, %v459_v26  ;;  %v573_v58 = vrot.slane %v1916_v11, 3  ;;  %v640_v2 = vld [vmem:[%s2334_s0 + $0x35] sm:$0x1] }
  0x52   :  { %1373 = vlog2.f32 %v461_v29  ;;  %v586_v0 = vmul.f32 %v1875_v62, %v1916_v11  ;;  %v404_v27 = vadd.f32 %v396_v1, %v1871_v37  ;;  %v517_v33 = vsub.f32 1.0, %v460_v25 }
  0x53   :  { %1375 = vlog2.f32 %v462_v17  ;;  %v587_v34 = vmul.f32 %v1880_v3, %v571_v63  ;;  %v422_v59 = vrot.slane %v403_v20, 5  ;;  %v518_v36 = vsub.f32 1.0, %v461_v29 }
  0x54   :  { %1377 = vlog2.f32 %v512_v38  ;;  %v1931_v35 = vpop.eup %1355  ;;  %v588_v39 = vmul.f32 %v1887_v12, %v572_v23  ;;  %v399_v54 = vmul.f32 %v351_v7, %v351_v7  ;;  %v421_v6 = vsel %vm420_vm1, %v419_v30, %v418_v24 }
  0x55   :  { %1379 = vlog2.f32 %v513_v28  ;;  %v1934_v41 = vpop.eup %1357  ;;  %v519_v47 = vsub.f32 1.0, %v462_v17  ;;  %v405_v37 = vadd.f32 %v397_v60, %v1873_v50  ;;  %v589_v3 = vmul.f32 %v1892_v45, %v573_v58 }
  0x56   :  { %1381 = vlog2.f32 %v514_v21  ;;  %v1937_v62 = vpop.eup %1359  ;;  %v594_v55 = vsub.f32 1.0, %v586_v0  ;;  %v425_v12 = vrot.slane %v404_v27, 4  ;;  %v574_v51 = vrot.slane %v1916_v11, 4 }
  0x57   :  { %1383 = vlog2.f32 %v515_v31  ;;  %v595_v4 = vsub.f32 1.0, %v587_v34  ;;  %v424_v5 = vsel %vm423_vm2, %v422_v59, %v421_v6  ;;  %v575_v50 = vrot.slane %v1916_v11, 5  ;;  %v800_v59 = vld [vmem:[%s2334_s0 + $0xe] sm:$0x1]  ;;  %v802_v6 = vld [vmem:[%s2334_s0 + $0x1e] sm:$0x1] }
  0x58   :  { %1385 = vlog2.f32 %v516_v32  ;;  %v596_v45 = vsub.f32 1.0, %v588_v39  ;;  %v406_v15 = vadd.f32 %v398_v53, %v1877_v40  ;;  %v576_v18 = vrot.slane %v1916_v11, 6 }
  0x59   :  { %v1944_v61 = vpop.eup %1361  ;;  %1387 = vlog2.f32 %v517_v33  ;;  %v1203_v1 = vmul.f32 -1.442695, %v637_v42  ;;  %v428_v22 = vrot.slane %v405_v37, 3  ;;  %v597_v7 = vsub.f32 1.0, %v589_v3 }
  0x5a   :  { %v1947_v8 = vpop.eup %1363  ;;  %1389 = vlog2.f32 %v518_v36  ;;  %v427_v40 = vsel %vm426_vm3, %v425_v12, %v424_v5  ;;  %v590_v60 = vmul.f32 %v1897_v14, %v574_v51  ;;  %v1204_v26 = vmul.f32 -1.442695, %v638_v9 }
  0x5b   :  { %v1954_v13 = vpop.eup %1365  ;;  %1391 = vlog2.f32 %v519_v47  ;;  %v407_v43 = vadd.f32 %v399_v54, %v1884_v57  ;;  %v591_v25 = vmul.f32 %v1901_v46, %v575_v50  ;;  %v1205_v53 = vmul.f32 -1.442695, %v639_v10  ;;  %v803_v47 = vld [vmem:[%s2334_s0 + $0x26] sm:$0x1]  ;;  %v806_v50 = vld [vmem:[%s2334_s0 + $0x3e] sm:$0x1] }
  0x5c   :  { %v1961_v19 = vpop.eup %1367  ;;  %1393 = vlog2.f32 %v594_v55  ;;  %v431_v38 = vrot.slane %v406_v15, 2  ;;  %v592_v17 = vmul.f32 %v1905_v48, %v576_v18  ;;  %v1206_v14 = vmul.f32 -1.442695, %v640_v2  ;;  %v805_v55 = vld [vmem:[%s2334_s0 + $0x36] sm:$0x1] }
  0x5d   :  { %v1966_v52 = vpop.eup %1369  ;;  %1395 = vlog2.f32 %v595_v4  ;;  %v430_v63 = vsel %vm429_vm4, %v428_v22, %v427_v40  ;;  %v1207_v20 = vmul.f32 -1.442695, %v641_v16  ;;  %v577_v57 = vrot.slane %v1916_v11, 7  ;;  %v799_v11 = vld [vmem:[%s2334_s0 + $0x6] sm:$0x1] }
  0x5e   :  { %v1973_v44 = vpop.eup %1371  ;;  %1397 = vlog2.f32 %v596_v45  ;;  %v598_v46 = vsub.f32 1.0, %v590_v60  ;;  %v434_v24 = vrot.slane %v407_v43, 1  ;;  %v599_v30 = vsub.f32 1.0, %v591_v25 }
  0x5f   :  { %v1977_v29 = vpop.eup %1373  ;;  %1399 = vpow2.f32 %v1203_v1  ;;  %v433_v31 = vsel %vm432_vm5, %v431_v38, %v430_v63  ;;  %v600_v32 = vsub.f32 1.0, %v592_v17  ;;  %v666_v0 = vadd.f32 1.0, %v1931_v35  ;;  %v2005_v35 = vld [vmem:[%s2335_s1 + $0x30] sm:$0xff] }
  0x60   :  { %v1980_v28 = vpop.eup %1375  ;;  %1401 = vlog2.f32 %v597_v7  ;;  %v593_v33 = vmul.f32 %v1911_v49, %v577_v57  ;;  %v667_v34 = vadd.f32 1.0, %v1934_v41  ;;  %v436_v39 = vsel %vm435_vm6, %v434_v24, %v433_v31  ;;  %v801_v49 = vld [vmem:[%s2334_s0 + $0x16] sm:$0x1] }
  0x61   :  { %v1983_v21 = vpop.eup %1377  ;;  %1403 = vpow2.f32 %v1204_v26  ;;  %v668_v54 = vadd.f32 1.0, %v1937_v62  ;;  %v1209_v37 = vmul.f32 -1.442695, %v799_v11  ;;  %v804_v62 = vld [vmem:[%s2334_s0 + $0x2e] sm:$0x1]  ;;  %v2031_v51 = vmul.f32 %v436_v39, %v1858_v56 }
  0x62   :  { %v1380_v23 = vpop.eup %1379  ;;  %1405 = vpow2.f32 %v1205_v53  ;;  %v1210_v42 = vmul.f32 -1.442695, %v800_v59  ;;  %v466_v4 = vmul.f32 0.6931472, %v1947_v8  ;;  %v601_v5 = vsub.f32 1.0, %v593_v33 }
  0x63   :  { %v1382_v48 = vpop.eup %1381  ;;  %1407 = vpow2.f32 %v1206_v14  ;;  %v464_v9 = vmul.f32 0.6931472, %v1944_v61  ;;  %v511_v15 = vsub.f32 1.0, %v2005_v35  ;;  %v1211_v18 = vmul.f32 -1.442695, %v801_v49 }
  0x64   :  { %v1987_v58 = vpop.eup %1383  ;;  %1409 = vpow2.f32 %v1207_v20  ;;  %v523_v56 = vmul.f32 0.6931472, %v1380_v23  ;;  %v1212_v1 = vmul.f32 -1.442695, %v802_v6  ;;  %v1213_v8 = vmul.f32 -1.442695, %v803_v47 }
  0x65   :  { %v1993_v27 = vpop.eup %1385  ;;  %1411 = vlog2.f32 %v598_v46  ;;  %v468_v7 = vmul.f32 0.6931472, %v1954_v13  ;;  %v470_v2 = vmul.f32 0.6931472, %v1961_v19  ;;  %v1214_v40 = vmul.f32 -1.442695, %v804_v62 }
  0x66   :  { %v2000_v36 = vpop.eup %1387  ;;  %1413 = vlog2.f32 %v599_v30  ;;  %v480_v61 = vmax.f32 %v466_v4, -100.0  ;;  %v1215_v16 = vmul.f32 -1.442695, %v805_v55  ;;  %v1216_v26 = vmul.f32 -1.442695, %v806_v50 }
  0x67   :  { %v2012_v41 = vpop.eup %1389  ;;  %1415 = vlog2.f32 %v600_v32  ;;  %v472_v25 = vmul.f32 0.6931472, %v1966_v52  ;;  %v479_v53 = vmax.f32 %v464_v9, -100.0  ;;  %v525_v38 = vmul.f32 0.6931472, %v1382_v48 }
  0x68   :  { %v2020_v3 = vpop.eup %1391  ;;  %1417 = vrcp.f32 %v666_v0  ;;  %v521_v14 = vmul.f32 0.6931472, %v1983_v21  ;;  %v537_v13 = vmax.f32 %v523_v56, -100.0  ;;  %v2050_v20 = vmul.f32 0.6931472, %v1973_v44 }
  0x69   :  { %v2028_v12 = vpop.eup %1393  ;;  %1419 = vrcp.f32 %v667_v34  ;;  %v481_v57 = vmax.f32 %v468_v7, -100.0  ;;  %v482_v46 = vmax.f32 %v470_v2, -100.0  ;;  %v495_v24 = vrot.slane %v480_v61, 7 }
  0x6a   :  { %v2037_v45 = vpop.eup %1395  ;;  %1421 = vrcp.f32 %v668_v54  ;;  %v527_v52 = vmul.f32 0.6931472, %v1987_v58  ;;  %v2056_v21 = vmul.f32 0.6931472, %v1977_v29  ;;  %v538_v31 = vmax.f32 %v525_v38, -100.0 }
  0x6b   :  { %v2041_v10 = vpop.eup %1397  ;;  %1423 = vpow2.f32 %v1209_v37  ;;  %v536_v44 = vmax.f32 %v521_v14, -100.0  ;;  %v552_v11 = vrot.slane %v537_v13, 7  ;;  %v497_v59 = vrot.slane %v481_v57, 6 }
  0x6c   :  { %v1400_v22 = vpop.eup %1399  ;;  %1425 = vpow2.f32 %v1210_v42  ;;  %v529_v58 = vmul.f32 0.6931472, %v1993_v27  ;;  %v483_v49 = vmax.f32 %v472_v25, -100.0  ;;  %v496_v29 = vsel %vm417_vm0, %v495_v24, %v479_v53  ;;  %v2090_v24 = vld [vmem:[%s2335_s1 + $0x40] sm:$0xff] }
  0x6d   :  { %v2045_v60 = vpop.eup %1401  ;;  %1427 = vlog2.f32 %v601_v5  ;;  %v669_v63 = vadd.f32 1.0, %v1400_v22  ;;  %v539_v6 = vmax.f32 %v527_v52, -100.0  ;;  %v2065_v37 = vmul.f32 0.6931472, %v1980_v28 }
  0x6e   :  { %v1404_v43 = vpop.eup %1403  ;;  %1429 = vpow2.f32 %v1211_v18  ;;  %v484_v62 = vmax.f32 %v2050_v20, -100.0  ;;  %v554_v55 = vrot.slane %v538_v31, 6  ;;  %v499_v4 = vrot.slane %v482_v46, 5 }
  0x6f   :  { %v1406_v17 = vpop.eup %1405  ;;  %1431 = vpow2.f32 %v1212_v1  ;;  %v670_v30 = vadd.f32 1.0, %v1404_v43  ;;  %v531_v27 = vmul.f32 0.6931472, %v2000_v36  ;;  %v553_v5 = vsel %vm417_vm0, %v552_v11, %v536_v44 }
  0x70   :  { %v1408_v19 = vpop.eup %1407  ;;  %1433 = vpow2.f32 %v1213_v8  ;;  %v671_v32 = vadd.f32 1.0, %v1406_v17  ;;  %v498_v9 = vsel %vm420_vm1, %v497_v59, %v496_v29  ;;  %v540_v18 = vmax.f32 %v529_v58, -100.0  ;;  %v2080_v17 = vld [vmem:[%s2335_s1 + $0x38] sm:$0xff] }
  0x71   :  { %v1410_v23 = vpop.eup %1409  ;;  %1435 = vpow2.f32 %v1214_v40  ;;  %v672_v33 = vadd.f32 1.0, %v1408_v19  ;;  %v501_v28 = vrot.slane %v483_v49, 4  ;;  %v556_v8 = vrot.slane %v539_v6, 5 }
  0x72   :  { %v2053_v48 = vpop.eup %1411  ;;  %1437 = vpow2.f32 %v1215_v16  ;;  %v673_v39 = vadd.f32 1.0, %v1410_v23  ;;  %v533_v2 = vmul.f32 0.6931472, %v2012_v41  ;;  %v555_v36 = vsel %vm420_vm1, %v554_v55, %v553_v5 }
  0x73   :  { %v2058_v0 = vpop.eup %1413  ;;  %1439 = vrcp.f32 %v669_v63  ;;  %v500_v16 = vsel %vm423_vm2, %v499_v4, %v498_v9  ;;  %v485_v53 = vmax.f32 %v2056_v21, -100.0  ;;  %v558_v38 = vrot.slane %v540_v18, 4 }
  0x74   :  { %v2060_v34 = vpop.eup %1415  ;;  %1441 = vpow2.f32 %v1216_v26  ;;  %v541_v26 = vmax.f32 %v531_v27, -100.0  ;;  %v503_v13 = vrot.slane %v484_v62, 3  ;;  %v535_v63 = vmul.f32 0.6931472, %v2020_v3 }
  0x75   :  { %v1418_v54 = vpop.eup %1417  ;;  %1443 = vrcp.f32 %v670_v30  ;;  %v557_v19 = vsel %vm423_vm2, %v556_v8, %v555_v36  ;;  %v502_v57 = vsel %vm426_vm3, %v501_v28, %v500_v16  ;;  %v542_v46 = vmax.f32 %v533_v2, -100.0 }
  0x76   :  { %v1420_v47 = vpop.eup %1419  ;;  %1445 = vrcp.f32 %v671_v32  ;;  %v741_v56 = vsub.f32 1.0, %v1418_v54  ;;  %v560_v30 = vrot.slane %v541_v26, 3  ;;  %v605_v3 = vmul.f32 0.6931472, %v2037_v45 }
  0x77   :  { %v1422_v42 = vpop.eup %1421  ;;  %1447 = vrcp.f32 %v672_v33  ;;  %v742_v22 = vsub.f32 1.0, %v1420_v47  ;;  %v740_v21 = vsub.f32 1.0, %v2080_v17  ;;  %v486_v32 = vmax.f32 %v2065_v37, -100.0 }
  0x78   :  { %v1424_v50 = vpop.eup %1423  ;;  %1449 = vrcp.f32 %v673_v39  ;;  %v743_v40 = vsub.f32 1.0, %v1422_v42  ;;  %v505_v44 = vrot.slane %v485_v53, 2  ;;  %v559_v11 = vsel %vm426_vm3, %v558_v38, %v557_v19  ;;  %v965_v38 = vld [vmem:[%s2334_s0 + $0xf] sm:$0x1] }
  0x79   :  { %v1426_v1 = vpop.eup %1425  ;;  %1451 = vlog2.f32 %v1418_v54  ;;  %v831_v43 = vadd.f32 1.0, %v1424_v50  ;;  %v504_v59 = vsel %vm429_vm4, %v503_v13, %v502_v57  ;;  %v543_v58 = vmax.f32 %v535_v63, -100.0  ;;  %v966_v63 = vld [vmem:[%s2334_s0 + $0x17] sm:$0x1] }
  0x7a   :  { %v2071_v7 = vpop.eup %1427  ;;  %1453 = vlog2.f32 %v1420_v47  ;;  %v832_v41 = vadd.f32 1.0, %v1426_v1  ;;  %v905_v39 = vsub.f32 1.0, %v2090_v24  ;;  %v562_v49 = vrot.slane %v542_v46, 2 }
  0x7b   :  { %v1430_v61 = vpop.eup %1429  ;;  %1455 = vlog2.f32 %v1422_v42  ;;  %v603_v45 = vmul.f32 0.6931472, %v2028_v12  ;;  %v607_v29 = vmul.f32 0.6931472, %v2041_v10  ;;  %v561_v47 = vsel %vm429_vm4, %v560_v30, %v559_v11  ;;  %v964_v10 = vld [vmem:[%s2334_s0 + $0x7] sm:$0x1] }
  0x7c   :  { %v1432_v25 = vpop.eup %1431  ;;  %1457 = vlog2.f32 %v741_v56  ;;  %v833_v23 = vadd.f32 1.0, %v1430_v61  ;;  %v619_v37 = vmax.f32 %v605_v3, -100.0  ;;  %v506_v42 = vsel %vm432_vm5, %v505_v44, %v504_v59 }
  0x7d   :  { %v1434_v14 = vpop.eup %1433  ;;  %1459 = vlog2.f32 %v742_v22  ;;  %v507_v4 = vrot.slane %v486_v32, 1  ;;  %v834_v27 = vadd.f32 1.0, %v1432_v25  ;;  %v564_v50 = vrot.slane %v543_v58, 1 }
  0x7e   :  { %v2084_v20 = vpop.eup %1435  ;;  %1461 = vlog2.f32 %v743_v40  ;;  %v609_v9 = vmul.f32 0.6931472, %v2045_v60  ;;  %v835_v12 = vadd.f32 1.0, %v1434_v14  ;;  %v563_v56 = vsel %vm432_vm5, %v562_v49, %v561_v47 }
  0x7f   :  { %v2092_v52 = vpop.eup %1437  ;;  %1463 = vrcp.f32 %v831_v43  ;;  %v620_v1 = vmax.f32 %v607_v29, -100.0  ;;  %v618_v22 = vmax.f32 %v603_v45, -100.0  ;;  %v627_v2 = vsub.f32 0.0, %v619_v37 }
  0x80   :  { %v1440_v31 = vpop.eup %1439  ;;  %1465 = vrcp.f32 %v832_v41  ;;  %v611_v40 = vmul.f32 0.6931472, %v2053_v48  ;;  %v2116_v16 = vmul.f32 -1.442695, %v964_v10  ;;  %v508_v43 = vsel %vm435_vm6, %v507_v4, %v506_v42 }
  0x81   :  { %v1442_v33 = vpop.eup %1441  ;;  %1467 = vlog2.f32 %v1440_v31  ;;  %v744_v62 = vsub.f32 1.0, %v1440_v31  ;;  %v621_v25 = vmax.f32 %v609_v9, -100.0  ;;  %v565_v14 = vsel %vm435_vm6, %v564_v50, %v563_v56  ;;  %v971_v50 = vld [vmem:[%s2334_s0 + $0x3f] sm:$0x1] }
  0x82   :  { %v1444_v54 = vpop.eup %1443  ;;  %1469 = vrcp.f32 %v833_v23  ;;  %v628_v13 = vsub.f32 0.0, %v620_v1  ;;  %v836_v48 = vadd.f32 1.0, %v2084_v20  ;;  %v626_v57 = vsub.f32 0.0, %v618_v22  ;;  %v967_v23 = vld [vmem:[%s2334_s0 + $0x1f] sm:$0x1]  ;;  %v2170_v1 = vld [vmem:[%s2335_s1 + $0x48] sm:$0xff] }
  0x83   :  { %v1446_v6 = vpop.eup %1445  ;;  %1471 = vlog2.f32 %v1444_v54  ;;  %v745_v28 = vsub.f32 1.0, %v1444_v54  ;;  %v837_v46 = vadd.f32 1.0, %v2092_v52  ;;  %v1133_v30 = vmul.f32 0.5, %v627_v2  ;;  %v968_v20 = vld [vmem:[%s2334_s0 + $0x27] sm:$0x1] }
  0x84   :  { %v1448_v55 = vpop.eup %1447  ;;  %1473 = vlog2.f32 %v1446_v6  ;;  %v746_v36 = vsub.f32 1.0, %v1446_v6  ;;  %v622_v31 = vmax.f32 %v611_v40, -100.0  ;;  %v838_v32 = vadd.f32 1.0, %v1442_v33 }
  0x85   :  { %v1450_v5 = vpop.eup %1449  ;;  %1475 = vlog2.f32 %v1448_v55  ;;  %v747_v61 = vsub.f32 1.0, %v1448_v55  ;;  %v2138_v44 = vmul.f32 -1.442695, %v965_v38  ;;  %v613_v59 = vmul.f32 0.6931472, %v2058_v0 }
  0x86   :  { %v2108_v18 = vpop.eup %1451  ;;  %1477 = vlog2.f32 %v1450_v5  ;;  %v748_v53 = vsub.f32 1.0, %v1450_v5  ;;  %v629_v58 = vsub.f32 0.0, %v621_v25  ;;  %v2141_v52 = vmul.f32 -1.442695, %v966_v63  ;;  %v969_v0 = vld [vmem:[%s2334_s0 + $0x2f] sm:$0x1] }
  0x87   :  { %v2111_v8 = vpop.eup %1453  ;;  %1479 = vlog2.f32 %v744_v62  ;;  %v510_v49 = vmul.f32 %v2005_v35, %v508_v43  ;;  %v567_v33 = vmul.f32 %v565_v14, %v511_v15  ;;  %v1134_v45 = vmul.f32 0.5, %v628_v13  ;;  %v970_v35 = vld [vmem:[%s2334_s0 + $0x37] sm:$0x1] }
  0x88   :  { %v2113_v60 = vpop.eup %1455  ;;  %1481 = vrcp.f32 %v834_v27  ;;  %v2153_v6 = vmul.f32 -1.442695, %v967_v23  ;;  %v1132_v47 = vmul.f32 0.5, %v626_v57  ;;  %v1148_v37 = vrot.slane %v1133_v30, 7 }
  0x89   :  { %v2118_v26 = vpop.eup %1457  ;;  %1483 = vrcp.f32 %v835_v12  ;;  %v630_v55 = vsub.f32 0.0, %v622_v31  ;;  %v1222_v15 = vmul.f32 -1.442695, %v968_v20  ;;  %v623_v27 = vmax.f32 %v613_v59, -100.0 }
  0x8a   :  { %v1460_v41 = vpop.eup %1459  ;;  %1485 = vlog2.f32 %v745_v28  ;;  %v1135_v9 = vmul.f32 0.5, %v629_v58  ;;  %v568_v10 = vadd.f32 %v567_v33, %v510_v49  ;;  %v1223_v56 = vmul.f32 -1.442695, %v969_v0 }
  0x8b   :  { %v2129_v19 = vpop.eup %1461  ;;  %1487 = vlog2.f32 %v746_v36  ;;  %v1150_v28 = vrot.slane %v1134_v45, 6  ;;  %v695_v2 = vmul.f32 0.6931472, %v2111_v8  ;;  %v1224_v36 = vmul.f32 -1.442695, %v970_v35 }
  0x8c   :  { %v1464_v3 = vpop.eup %1463  ;;  %1489 = vlog2.f32 %v747_v61  ;;  %v1149_v40 = vsel %vm417_vm0, %v1148_v37, %v1132_v47  ;;  %v752_v43 = vmul.f32 0.6931472, %v1460_v41  ;;  %v1225_v25 = vmul.f32 -1.442695, %v971_v50 }
  0x8d   :  { %v1466_v11 = vpop.eup %1465  ;;  %1491 = vlog2.f32 %v748_v53  ;;  %v906_v42 = vsub.f32 1.0, %v1464_v3  ;;  %v1136_v53 = vmul.f32 0.5, %v630_v55  ;;  %v631_v14 = vsub.f32 0.0, %v623_v27 }
  0x8e   :  { %v2143_v54 = vpop.eup %1467  ;;  %1493 = vrcp.f32 %v836_v48  ;;  %v907_v5 = vsub.f32 1.0, %v1466_v11  ;;  %v1070_v13 = vsub.f32 1.0, %v2170_v1  ;;  %v1152_v48 = vrot.slane %v1135_v9, 5 }
  0x8f   :  { %v2148_v29 = vpop.eup %1469  ;;  %1495 = vrcp.f32 %v837_v46  ;;  %v569_v8 = vsub.f32 0.0, %v568_v10  ;;  %v693_v57 = vmul.f32 0.6931472, %v2108_v18  ;;  %v1151_v46 = vsel %vm420_vm1, %v1150_v28, %v1149_v40 }
  0x90   :  { %v2155_v62 = vpop.eup %1471  ;;  %1497 = vrcp.f32 %v838_v32  ;;  %v697_v23 = vmul.f32 0.6931472, %v2113_v60  ;;  %v709_v30 = vmax.f32 %v695_v2, -100.0  ;;  %v754_v32 = vmul.f32 0.6931472, %v2129_v19 }
  0x91   :  { %v2160_v4 = vpop.eup %1473  ;;  %1499 = vlog2.f32 %v1464_v3  ;;  %v750_v3 = vmul.f32 0.6931472, %v2118_v26  ;;  %v766_v20 = vmax.f32 %v752_v43, -100.0  ;;  %v1154_v18 = vrot.slane %v1136_v53, 4 }
  0x92   :  { %v2165_v12 = vpop.eup %1475  ;;  %1501 = vlog2.f32 %v1466_v11  ;;  %v615_v59 = vmul.f32 0.6931472, %v2060_v34  ;;  %v2200_v60 = vmul.f32 0.5, %v631_v14  ;;  %v1153_v26 = vsel %vm423_vm2, %v1152_v48, %v1151_v46 }
  0x93   :  { %v2172_v22 = vpop.eup %1477  ;;  %1503 = vlog2.f32 %v2148_v29  ;;  %v2206_v49 = vmul.f32 0.6931472, %v2071_v7  ;;  %v699_v19 = vmul.f32 0.6931472, %v2143_v54  ;;  %v708_v33 = vmax.f32 %v693_v57, -100.0 }
  0x94   :  { %v2177_v61 = vpop.eup %1479  ;;  %1505 = vlog2.f32 %v906_v42  ;;  %v710_v45 = vmax.f32 %v697_v23, -100.0  ;;  %v724_v0 = vrot.slane %v709_v30, 7  ;;  %v765_v34 = vmax.f32 %v750_v3, -100.0 }
  0x95   :  { %v2179_v38 = vpop.eup %1481  ;;  %1507 = vlog2.f32 %v907_v5  ;;  %v767_v47 = vmax.f32 %v754_v32, -100.0  ;;  %v781_v37 = vrot.slane %v766_v20, 7  ;;  %v908_v55 = vsub.f32 1.0, %v2148_v29 }
  0x96   :  { %v2182_v63 = vpop.eup %1483  ;;  %1509 = vlog2.f32 %v2179_v38  ;;  %v624_v7 = vmax.f32 %v615_v59, -100.0  ;;  %v2212_v35 = vmul.f32 5.0, %v569_v8  ;;  %v1155_v54 = vsel %vm426_vm3, %v1154_v18, %v1153_v26 }
  0x97   :  { %v2187_v41 = vpop.eup %1485  ;;  %1511 = vlog2.f32 %v2182_v63  ;;  %v701_v27 = vmul.f32 0.6931472, %v2155_v62  ;;  %v711_v5 = vmax.f32 %v699_v19, -100.0  ;;  %v625_v9 = vmax.f32 %v2206_v49, -100.0 }
  0x98   :  { %v2192_v31 = vpop.eup %1487  ;;  %1513 = vpow2.f32 %v2116_v16  ;;  %v726_v29 = vrot.slane %v710_v45, 6  ;;  %v782_v28 = vsel %vm417_vm0, %v781_v37, %v765_v34  ;;  %v783_v2 = vrot.slane %v767_v47, 6 }
  0x99   :  { %v2196_v11 = vpop.eup %1489  ;;  %1515 = vpow2.f32 %v2138_v44  ;;  %v703_v62 = vmul.f32 0.6931472, %v2160_v4  ;;  %v910_v43 = vsub.f32 1.0, %v2182_v63  ;;  %v756_v57 = vmul.f32 0.6931472, %v2177_v61 }
  0x9a   :  { %v2203_v58 = vpop.eup %1491  ;;  %1517 = vpow2.f32 %v2141_v52  ;;  %v2239_v23 = vmul.f32 0.6931472, %v2172_v22  ;;  %v784_v32 = vsel %vm420_vm1, %v783_v2, %v782_v28  ;;  %v758_v22 = vmul.f32 0.6931472, %v2187_v41 }
  0x9b   :  { %v1494_v16 = vpop.eup %1493  ;;  %1519 = vpow2.f32 %v2153_v6  ;;  %v1156_v6 = vrot.slane %v2200_v60, 3  ;;  %v713_v3 = vmax.f32 %v703_v62, -100.0  ;;  %v768_v19 = vmax.f32 %v756_v57, -100.0 }
  0x9c   :  { %v1496_v44 = vpop.eup %1495  ;;  %1521 = vpow2.f32 %v1222_v15  ;;  %v909_v15 = vsub.f32 1.0, %v2179_v38  ;;  %v712_v38 = vmax.f32 %v701_v27, -100.0  ;;  %v911_v14 = vsub.f32 1.0, %v1494_v16 }
  0x9d   :  { %v1498_v42 = vpop.eup %1497  ;;  %1523 = vpow2.f32 %v1223_v56  ;;  %v725_v56 = vsel %vm417_vm0, %v724_v0, %v708_v33  ;;  %v912_v46 = vsub.f32 1.0, %v1496_v44  ;;  %v2243_v20 = vsel %vm429_vm4, %v1156_v6, %v1155_v54 }
  0x9e   :  { %v2215_v52 = vpop.eup %1499  ;;  %1525 = vpow2.f32 %v1224_v36  ;;  %v2227_v36 = vmul.f32 0.6931472, %v2165_v12  ;;  %v727_v8 = vsel %vm420_vm1, %v726_v29, %v725_v56  ;;  %v2236_v12 = vsub.f32 0.0, %v624_v7 }
  0x9f   :  { %v1502_v50 = vpop.eup %1501  ;;  %1527 = vpow2.f32 %v1225_v25  ;;  %v728_v25 = vrot.slane %v711_v5, 5  ;;  %v913_v63 = vsub.f32 1.0, %v1498_v42  ;;  %v730_v60 = vrot.slane %v712_v38, 4 }
  0xa0   :  { %v1504_v10 = vpop.eup %1503  ;;  %1529 = vlog2.f32 %v908_v55  ;;  %v714_v18 = vmax.f32 %v2227_v36, -100.0  ;;  %v715_v45 = vmax.f32 %v2239_v23, -100.0  ;;  %v732_v47 = vrot.slane %v713_v3, 3 }
  0xa1   :  { %v2223_v40 = vpop.eup %1505  ;;  %1531 = vlog2.f32 %v1494_v16  ;;  %v729_v59 = vsel %vm423_vm2, %v728_v25, %v727_v8  ;;  %v860_v37 = vmul.f32 0.6931472, %v1502_v50  ;;  %v760_v54 = vmul.f32 0.6931472, %v2192_v31 }
  0xa2   :  { %v1508_v53 = vpop.eup %1507  ;;  %1533 = vlog2.f32 %v1496_v44  ;;  %v731_v7 = vsel %vm426_vm3, %v730_v60, %v729_v59  ;;  %v769_v5 = vmax.f32 %v758_v22, -100.0  ;;  %v785_v6 = vrot.slane %v768_v19, 5 }
  0xa3   :  { %v2230_v48 = vpop.eup %1509  ;;  %1535 = vlog2.f32 %v909_v15  ;;  %v862_v56 = vmul.f32 0.6931472, %v1504_v10  ;;  %v917_v28 = vmul.f32 0.6931472, %v1508_v53  ;;  %v858_v62 = vmul.f32 0.6931472, %v2215_v52 }
  0xa4   :  { %v2234_v4 = vpop.eup %1511  ;;  %1537 = vlog2.f32 %v1498_v42  ;;  %v874_v36 = vmax.f32 %v860_v37, -100.0  ;;  %v762_v31 = vmul.f32 0.6931472, %v2196_v11  ;;  %v764_v25 = vmul.f32 0.6931472, %v2203_v58 }
  0xa5   :  { %v1514_v30 = vpop.eup %1513  ;;  %1539 = vlog2.f32 %v910_v43  ;;  %v786_v57 = vsel %vm423_vm2, %v785_v6, %v784_v32  ;;  %v787_v10 = vrot.slane %v769_v5, 4  ;;  %v915_v53 = vmul.f32 0.6931472, %v2223_v40 }
  0xa6   :  { %v1516_v61 = vpop.eup %1515  ;;  %1541 = vlog2.f32 %v911_v14  ;;  %v996_v33 = vadd.f32 1.0, %v1514_v30  ;;  %v770_v14 = vmax.f32 %v760_v54, -100.0  ;;  %v875_v23 = vmax.f32 %v862_v56, -100.0 }
  0xa7   :  { %v1518_v26 = vpop.eup %1517  ;;  %1543 = vlog2.f32 %v912_v46  ;;  %v997_v0 = vadd.f32 1.0, %v1516_v61  ;;  %v734_v3 = vrot.slane %v714_v18, 2  ;;  %v864_v11 = vmul.f32 0.6931472, %v2230_v48 }
  0xa8   :  { %v1520_v16 = vpop.eup %1519  ;;  %1545 = vlog2.f32 %v913_v63  ;;  %v998_v34 = vadd.f32 1.0, %v1518_v26  ;;  %v931_v63 = vmax.f32 %v917_v28, -100.0  ;;  %v873_v61 = vmax.f32 %v858_v62, -100.0 }
  0xa9   :  { %v1522_v44 = vpop.eup %1521  ;;  %v999_v55 = vadd.f32 1.0, %v1520_v16  ;;  %1547 = vrcp.f32 %v996_v33  ;;  %v889_v58 = vrot.slane %v874_v36, 7  ;;  %v2259_v60 = vsub.f32 0.0, %v625_v9 }
  0xaa   :  { %v1524_v42 = vpop.eup %1523  ;;  %v1000_v41 = vadd.f32 1.0, %v1522_v44  ;;  %1549 = vrcp.f32 %v997_v0  ;;  %v733_v32 = vsel %vm429_vm4, %v732_v47, %v731_v7  ;;  %v771_v40 = vmax.f32 %v762_v31, -100.0 }
  0xab   :  { %v1526_v27 = vpop.eup %1525  ;;  %v1001_v29 = vadd.f32 1.0, %v1524_v42  ;;  %1551 = vrcp.f32 %v998_v34  ;;  %v789_v26 = vrot.slane %v770_v14, 3  ;;  %v2262_v19 = vrot.slane %v715_v45, 1 }
  0xac   :  { %v1528_v15 = vpop.eup %1527  ;;  %v1002_v2 = vadd.f32 1.0, %v1526_v27  ;;  %1553 = vrcp.f32 %v999_v55  ;;  %v772_v33 = vmax.f32 %v764_v25, -100.0  ;;  %v788_v16 = vsel %vm426_vm3, %v787_v10, %v786_v57 }
  0xad   :  { %v1530_v50 = vpop.eup %1529  ;;  %v1003_v43 = vadd.f32 1.0, %v1528_v15  ;;  %1555 = vrcp.f32 %v1000_v41  ;;  %v891_v48 = vrot.slane %v875_v23, 6  ;;  %v930_v34 = vmax.f32 %v915_v53, -100.0 }
  0xae   :  { %v1532_v38 = vpop.eup %1531  ;;  %1557 = vrcp.f32 %v1001_v29  ;;  %v919_v52 = vmul.f32 0.6931472, %v1530_v50  ;;  %v946_v37 = vrot.slane %v931_v63, 7  ;;  %v2266_v49 = vsel %vm432_vm5, %v734_v3, %v733_v32 }
  0xaf   :  { %v1534_v8 = vpop.eup %1533  ;;  %1559 = vrcp.f32 %v1002_v2  ;;  %v866_v9 = vmul.f32 0.6931472, %v2234_v4  ;;  %v876_v47 = vmax.f32 %v864_v11, -100.0  ;;  %v890_v42 = vsel %vm417_vm0, %v889_v58, %v873_v61 }
  0xb0   :  { %v1536_v46 = vpop.eup %1535  ;;  %1561 = vrcp.f32 %v1003_v43  ;;  %v932_v44 = vmax.f32 %v919_v52, -100.0  ;;  %v790_v7 = vsel %vm429_vm4, %v789_v26, %v788_v16  ;;  %v791_v54 = vrot.slane %v771_v40, 2 }
  0xb1   :  { %v1538_v30 = vpop.eup %1537  ;;  %v921_v18 = vmul.f32 0.6931472, %v1536_v46  ;;  %v868_v41 = vmul.f32 0.6931472, %v1532_v38  ;;  %v2271_v6 = vrot.slane %v772_v33, 1  ;;  %v892_v28 = vsel %vm420_vm1, %v891_v48, %v890_v42 }
  0xb2   :  { %v1540_v59 = vpop.eup %1539  ;;  %v870_v29 = vmul.f32 0.6931472, %v1534_v8  ;;  %v947_v4 = vsel %vm417_vm0, %v946_v37, %v930_v34  ;;  %v948_v2 = vrot.slane %v932_v44, 6  ;;  %v877_v62 = vmax.f32 %v866_v9, -100.0 }
  0xb3   :  { %v1542_v22 = vpop.eup %1541  ;;  %v923_v27 = vmul.f32 0.6931472, %v1540_v59  ;;  %v933_v15 = vmax.f32 %v921_v18, -100.0  ;;  %v893_v36 = vrot.slane %v876_v47, 5  ;;  %v872_v31 = vmul.f32 0.6931472, %v1538_v30 }
  0xb4   :  { %v1544_v0 = vpop.eup %1543  ;;  %v925_v43 = vmul.f32 0.6931472, %v1542_v22  ;;  %v878_v25 = vmax.f32 %v868_v41, -100.0  ;;  %v879_v57 = vmax.f32 %v870_v29, -100.0  ;;  %v949_v52 = vsel %vm420_vm1, %v948_v2, %v947_v4 }
  0xb5   :  { %v1546_v55 = vpop.eup %1545  ;;  %v934_v14 = vmax.f32 %v923_v27, -100.0  ;;  %v950_v10 = vrot.slane %v933_v15, 5  ;;  %v927_v23 = vmul.f32 0.6931472, %v1544_v0  ;;  %v895_v11 = vrot.slane %v877_v62, 4 }
  0xb6   :  { %v1548_v45 = vpop.eup %1547  ;;  %v935_v61 = vmax.f32 %v925_v43, -100.0  ;;  %v894_v30 = vsel %vm423_vm2, %v893_v36, %v892_v28  ;;  %v929_v40 = vmul.f32 0.6931472, %v1546_v55  ;;  %v897_v33 = vrot.slane %v878_v25, 3 }
  0xb7   :  { %v1550_v5 = vpop.eup %1549  ;;  %1563 = vlog2.f32 %v1548_v45  ;;  %v1071_v53 = vsub.f32 1.0, %v1548_v45  ;;  %v952_v59 = vrot.slane %v934_v14, 4  ;;  %v951_v26 = vsel %vm423_vm2, %v950_v10, %v949_v52 }
  0xb8   :  { %v1552_v56 = vpop.eup %1551  ;;  %1565 = vlog2.f32 %v1550_v5  ;;  %v1072_v63 = vsub.f32 1.0, %v1550_v5  ;;  %v936_v16 = vmax.f32 %v927_v23, -100.0  ;;  %v896_v0 = vsel %vm426_vm3, %v895_v11, %v894_v30 }
  0xb9   :  { %v1554_v50 = vpop.eup %1553  ;;  %1567 = vlog2.f32 %v1552_v56  ;;  %v1073_v58 = vsub.f32 1.0, %v1552_v56  ;;  %v954_v48 = vrot.slane %v935_v61, 3  ;;  %v880_v44 = vmax.f32 %v872_v31, -100.0 }
  0xba   :  { %v1556_v38 = vpop.eup %1555  ;;  %1569 = vlog2.f32 %v1554_v50  ;;  %v1074_v32 = vsub.f32 1.0, %v1554_v50  ;;  %v953_v37 = vsel %vm426_vm3, %v952_v59, %v951_v26  ;;  %v792_v55 = vsel %vm432_vm5, %v791_v54, %v790_v7 }
  0xbb   :  { %v1558_v8 = vpop.eup %1557  ;;  %1571 = vlog2.f32 %v1556_v38  ;;  %v1075_v22 = vsub.f32 1.0, %v1556_v38  ;;  %v899_v47 = vrot.slane %v879_v57, 2  ;;  %v937_v42 = vmax.f32 %v929_v40, -100.0 }
  0xbc   :  { %v1560_v46 = vpop.eup %1559  ;;  %1573 = vlog2.f32 %v1558_v8  ;;  %v1076_v18 = vsub.f32 1.0, %v1558_v8  ;;  %v898_v41 = vsel %vm429_vm4, %v897_v33, %v896_v0  ;;  %v956_v27 = vrot.slane %v936_v16, 2 }
  0xbd   :  { %v1562_v3 = vpop.eup %1561  ;;  %1575 = vlog2.f32 %v1560_v46  ;;  %v1077_v34 = vsub.f32 1.0, %v1560_v46  ;;  %v2283_v5 = vmul.f32 0.5, %v2236_v12  ;;  %v737_v15 = vsel %vm435_vm6, %v2262_v19, %v2266_v49 }
  0xbe   :  { %1577 = vlog2.f32 %v1562_v3  ;;  %v1078_v9 = vsub.f32 1.0, %v1562_v3  ;;  %v955_v56 = vsel %vm429_vm4, %v954_v48, %v953_v37  ;;  %v794_v54 = vsel %vm435_vm6, %v2271_v6, %v792_v55 }
  0xbf   :  { %1579 = vlog2.f32 %v1071_v53  ;;  %v901_v4 = vrot.slane %v880_v44, 1  ;;  %v900_v12 = vsel %vm432_vm5, %v899_v47, %v898_v41  ;;  %v958_v62 = vrot.slane %v937_v42, 1 }
  0xc0   :  { %1581 = vlog2.f32 %v1072_v63  ;;  %v2293_v43 = vmul.f32 0.5, %v2259_v60  ;;  %v957_v49 = vsel %vm432_vm5, %v956_v27, %v955_v56  ;;  %v739_v6 = vmul.f32 %v2080_v17, %v737_v15 }
  0xc1   :  { %1583 = vlog2.f32 %v1073_v58  ;;  %v796_v8 = vmul.f32 %v794_v54, %v740_v21  ;;  %v902_v46 = vsel %vm435_vm6, %v901_v4, %v900_v12  ;;  %v959_v3 = vsel %vm435_vm6, %v958_v62, %v957_v49 }
  0xc2   :  { %1585 = vlog2.f32 %v1074_v32 }
  0xc3   :  { %1587 = vlog2.f32 %v1075_v22 }
  0xc4   :  { %v1564_v45 = vpop.eup %1563  ;;  %1589 = vlog2.f32 %v1076_v18 }
  0xc5   :  { %v1566_v29 = vpop.eup %1565  ;;  %v1023_v28 = vmul.f32 0.6931472, %v1564_v45  ;;  %1591 = vlog2.f32 %v1077_v34 }
  0xc6   :  { %v1568_v7 = vpop.eup %1567  ;;  %v1025_v2 = vmul.f32 0.6931472, %v1566_v29  ;;  %1593 = vlog2.f32 %v1078_v9  ;;  %v797_v9 = vadd.f32 %v796_v8, %v739_v6 }
  0xc7   :  { %v1570_v50 = vpop.eup %1569  ;;  %v1027_v36 = vmul.f32 0.6931472, %v1568_v7  ;;  %v1038_v31 = vmax.f32 %v1023_v28, -100.0  ;;  %v904_v28 = vmul.f32 %v2090_v24, %v902_v46  ;;  %v961_v7 = vmul.f32 %v959_v3, %v905_v39 }
  0xc8   :  { %v1572_v19 = vpop.eup %1571  ;;  %v1029_v38 = vmul.f32 0.6931472, %v1570_v50  ;;  %v1039_v25 = vmax.f32 %v1025_v2, -100.0 }
  0xc9   :  { %v1574_v14 = vpop.eup %1573  ;;  %v1031_v57 = vmul.f32 0.6931472, %v1572_v19  ;;  %v1040_v10 = vmax.f32 %v1027_v36, -100.0  ;;  %v962_v3 = vadd.f32 %v961_v7, %v904_v28 }
  0xca   :  { %v1576_v53 = vpop.eup %1575  ;;  %v1033_v23 = vmul.f32 0.6931472, %v1574_v14  ;;  %v1041_v60 = vmax.f32 %v1029_v38, -100.0  ;;  %v1054_v52 = vrot.slane %v1039_v25, 7 }
  0xcb   :  { %v1578_v63 = vpop.eup %1577  ;;  %v1035_v11 = vmul.f32 0.6931472, %v1576_v53  ;;  %v1042_v61 = vmax.f32 %v1031_v57, -100.0  ;;  %v1056_v58 = vrot.slane %v1040_v10, 6  ;;  %v1158_v53 = vrot.slane %v2283_v5, 2 }
  0xcc   :  { %v1580_v30 = vpop.eup %1579  ;;  %v1037_v59 = vmul.f32 0.6931472, %v1578_v63  ;;  %v1043_v32 = vmax.f32 %v1033_v23, -100.0  ;;  %v1055_v17 = vsel %vm417_vm0, %v1054_v52, %v1038_v31  ;;  %v1058_v21 = vrot.slane %v1041_v60, 5 }
  0xcd   :  { %v1582_v40 = vpop.eup %1581  ;;  %v1044_v26 = vmax.f32 %v1035_v11, -100.0  ;;  %v1057_v22 = vsel %vm420_vm1, %v1056_v58, %v1055_v17  ;;  %v1060_v33 = vrot.slane %v1042_v61, 4  ;;  %v1080_v16 = vmul.f32 0.6931472, %v1580_v30 }
  0xce   :  { %v1584_v18 = vpop.eup %1583  ;;  %v1045_v0 = vmax.f32 %v1037_v59, -100.0  ;;  %v1059_v48 = vsel %vm423_vm2, %v1058_v21, %v1057_v22  ;;  %v1062_v34 = vrot.slane %v1043_v32, 3  ;;  %v1082_v44 = vmul.f32 0.6931472, %v1582_v40 }
  0xcf   :  { %v1586_v37 = vpop.eup %1585  ;;  %v1061_v55 = vsel %vm426_vm3, %v1060_v33, %v1059_v48  ;;  %v1064_v47 = vrot.slane %v1044_v26, 2  ;;  %v1084_v42 = vmul.f32 0.6931472, %v1584_v18  ;;  %v1095_v29 = vmax.f32 %v1080_v16, -100.0 }
  0xd0   :  { %v1588_v45 = vpop.eup %1587  ;;  %v1063_v41 = vsel %vm429_vm4, %v1062_v34, %v1061_v55  ;;  %v1086_v27 = vmul.f32 0.6931472, %v1586_v37  ;;  %v1096_v15 = vmax.f32 %v1082_v44, -100.0  ;;  %v1066_v50 = vrot.slane %v1045_v0, 1  ;;  %v1595_v0 = vld [vmem:[%s2335_s1] sm:$0xff] }
  0xd1   :  { %v1590_v56 = vpop.eup %1589  ;;  %v1088_v54 = vmul.f32 0.6931472, %v1588_v45  ;;  %v1097_v4 = vmax.f32 %v1084_v42, -100.0  ;;  %v1065_v49 = vsel %vm432_vm5, %v1064_v47, %v1063_v41  ;;  %v798_v63 = vsub.f32 0.0, %v797_v9 }
  0xd2   :  { %v1592_v2 = vpop.eup %1591  ;;  %v1090_v12 = vmul.f32 0.6931472, %v1590_v56  ;;  %v1098_v62 = vmax.f32 %v1086_v27, -100.0  ;;  %v1111_v36 = vrot.slane %v1096_v15, 7  ;;  %v1067_v46 = vsel %vm435_vm6, %v1066_v50, %v1065_v49 }
  0xd3   :  { %v1594_v19 = vpop.eup %1593  ;;  %v1092_v38 = vmul.f32 0.6931472, %v1592_v2  ;;  %v1099_v31 = vmax.f32 %v1088_v54, -100.0  ;;  %v1113_v25 = vrot.slane %v1097_v4, 6  ;;  %v1160_v59 = vrot.slane %v2293_v43, 1 }
  0xd4   :  { %v1094_v14 = vmul.f32 0.6931472, %v1594_v19  ;;  %v1100_v6 = vmax.f32 %v1090_v12, -100.0  ;;  %v1112_v8 = vsel %vm417_vm0, %v1111_v36, %v1095_v29  ;;  %v1115_v57 = vrot.slane %v1098_v62, 5 }
  0xd5   :  { %v1101_v24 = vmax.f32 %v1092_v38, -100.0  ;;  %v1114_v39 = vsel %vm420_vm1, %v1113_v25, %v1112_v8  ;;  %v1117_v10 = vrot.slane %v1099_v31, 4  ;;  %v1069_v32 = vmul.f32 %v2170_v1, %v1067_v46 }
  0xd6   :  { %v1102_v23 = vmax.f32 %v1094_v14, -100.0  ;;  %v1116_v60 = vsel %vm423_vm2, %v1115_v57, %v1114_v39  ;;  %v1119_v52 = vrot.slane %v1100_v6, 3  ;;  %v1159_v17 = vsel %vm432_vm5, %v1158_v53, %v2243_v20 }
  0xd7   :  { %v1118_v11 = vsel %vm426_vm3, %v1117_v10, %v1116_v60  ;;  %v1121_v61 = vrot.slane %v1101_v24, 2  ;;  %v963_v40 = vsub.f32 %v798_v63, %v962_v3  ;;  %v1131_v22 = vadd.f32 %v2212_v35, %v2031_v51 }
  0xd8   :  { %v1120_v58 = vsel %vm429_vm4, %v1119_v52, %v1118_v11  ;;  %v1123_v30 = vrot.slane %v1102_v23, 1  ;;  %v1161_v33 = vsel %vm435_vm6, %v1160_v59, %v1159_v17 }
  0xd9   :  { %v1122_v5 = vsel %vm432_vm5, %v1121_v61, %v1120_v58  ;;  %v1163_v18 = vadd.f32 %v1161_v33, %v1131_v22 }
  0xda   :  { %v1124_v21 = vsel %vm435_vm6, %v1123_v30, %v1122_v5 }
  0xdb   :  { %v1126_v26 = vmul.f32 %v1124_v21, %v1070_v13 }
  0xdd   :  { %v1127_v16 = vadd.f32 %v1126_v26, %v1069_v32 }
  0xdf   :  { %v1128_v43 = vsub.f32 %v963_v40, %v1127_v16 }
  0xe1   :  { %v1129_v48 = vmul.f32 %v1595_v0, %v1128_v43 }
  0xe3   :  { %v1164_v20 = vadd.f32 %v1163_v18, %v1129_v48 }
  0xe5   :  { %1165 = vst [vmem:[%s2336_s2] sm:$0xff] %v1164_v20 }

</bundles_post_ra>
